<compile_context>
chip_gen: v6e
topology: v6e:2x2x1
jax: 0.10.0
libtpu: 0.0.40
codegen_flags: <defaults>
</compile_context>

<pallas_src>
import functools

import jax
import jax.numpy as jnp
import numpy as np
from jax.experimental import pallas as pl
from jax.experimental.pallas import tpu as pltpu


# ----------------------------------------------------------------------------
# Fused Pallas kernel: conv_a + bn_a + crelu  ->  conv_b + bn_b + residual + crelu
# ----------------------------------------------------------------------------
def _basicblock_kernel(x_ref, wa_ref, ba_ref, wb_ref, bb_ref, out_ref, stk_ref, *,
                       HW, W, alpha, abit):
    # x_ref  : (1, C, L)   input activations; Nb images concatenated along lanes (L = Nb*HW)
    # wa_ref : (P, 9*C)    conv_a weight, columns tap-major (t*C + c), bn_a scale folded in
    # ba_ref : (P, 1)      folded bn_a bias
    # wb_ref : (P, 9*P)    conv_b weight, bn_b scale AND stage-a dequant folded in
    # bb_ref : (P, 1)      folded bn_b bias
    # out_ref: (1, P, L)   lane-dense output
    # stk_ref: (9*C, L)    VMEM scratch holding the stacked rolled+masked operand
    C = x_ref.shape[1]
    L = x_ref.shape[2]
    qs = (2.0 ** abit - 1.0) / alpha          # ClippedReLU quantization scale
    inv_qs = 1.0 / qs                         # python constant -> no runtime divide

    # Border masks, built ONCE per step and reused by both convs.
    # Tap (dh, dw) reads pixel (h+dh-1, w+dw-1); rolled reads that fall outside the image
    # (including wraps across a row edge or across an image boundary in the lane dim)
    # must contribute zero -> mask the rolled input copies before the fused contraction.
    pos = jax.lax.broadcasted_iota(jnp.int32, (1, L), 1) % HW   # per-image pixel index
    col = pos % W
    col_m = [(col > 0), None, (col < W - 1)]                    # dw = 0 / 1 / 2
    row_m = [(pos >= W), None, (pos < HW - W)]                  # dh = 0 / 1 / 2
    masks = []
    for dh in range(3):
        for dw in range(3):
            r, c = row_m[dh], col_m[dw]
            if r is None and c is None:
                masks.append(None)
            elif r is None:
                masks.append(c.astype(jnp.float32))
            elif c is None:
                masks.append(r.astype(jnp.float32))
            else:
                masks.append((r & c).astype(jnp.float32))

    def stack_taps(src):
        # src: (C, L) value in vregs.  Fill stk_ref with 9 rolled+masked copies (tap-major).
        for dh in range(3):
            for dw in range(3):
                off = (dh - 1) * W + (dw - 1)              # flat per-image read offset
                xs = pltpu.roll(src, (-off) % L, axis=1) if off else src
                m = masks[dh * 3 + dw]
                if m is not None:
                    xs = xs * m
                t = dh * 3 + dw
                stk_ref[pl.ds(t * C, C), :] = xs

    x = x_ref[0]                                           # (C, L)

    # conv_a (+bn_a) as a single (P,9C)x(9C,L) matmul, then ClippedReLU -> integer codes.
    stack_taps(x)
    ya = jnp.dot(wa_ref[...], stk_ref[...],
                 preferred_element_type=jnp.float32) + ba_ref[...]
    codes_a = jnp.round(jnp.clip(ya, 0.0, alpha) * qs)     # values in {0 .. 2^abit-1}
    # TODO(synk): on v6e/v7x cast codes_a (and wb) to bf16 for the native bf16 MXU path.

    # conv_b (+bn_b, stage-a dequant folded into wb) + residual + ClippedReLU.
    stack_taps(codes_a)
    yb = jnp.dot(wb_ref[...], stk_ref[...],
                 preferred_element_type=jnp.float32) + bb_ref[...]
    yb = yb + x                                            # downsample is None
    out_ref[0] = (jnp.round(jnp.clip(yb, 0.0, alpha) * qs) * inv_qs).astype(out_ref.dtype)


def basicblock_pallas(xg, wa, ba, wb, bb, *, HW, W, alpha, abit):
    # xg: (G, C, L) with L = Nb*HW (images side-by-side along the lane dim)
    G, C, L = xg.shape
    P = wa.shape[0]
    kernel = functools.partial(_basicblock_kernel, HW=HW, W=W, alpha=alpha, abit=abit)
    return pl.pallas_call(
        kernel,
        out_shape=jax.ShapeDtypeStruct((G, P, L), jnp.float32),
        grid_spec=pltpu.PrefetchScalarGridSpec(
            num_scalar_prefetch=0,
            grid=(G,),                          # one image-group per step; "parallel" lets
            in_specs=[                          # v7x shard groups across its 2 TensorCores
                pl.BlockSpec((1, C, L), lambda g: (g, 0, 0)),
                pl.BlockSpec((P, 9 * C), lambda g: (0, 0)),
                pl.BlockSpec((P, 1), lambda g: (0, 0)),
                pl.BlockSpec((P, 9 * P), lambda g: (0, 0)),
                pl.BlockSpec((P, 1), lambda g: (0, 0)),
            ],
            out_specs=pl.BlockSpec((1, P, L), lambda g: (g, 0, 0)),
            scratch_shapes=[pltpu.VMEM((9 * C, L), jnp.float32)],
        ),
        compiler_params=pltpu.CompilerParams(
            dimension_semantics=("parallel",)),
    )(xg, wa, ba, wb, bb)


# ----------------------------------------------------------------------------
# Glue: weight quantization, BN folding, weight layout
# ----------------------------------------------------------------------------
def _quantize_weight_sawb_mean(w, nbit, k):
    # TODO(synk): int_conv2d's exact quantizer source was not provided; this is the
    # SAWB-style 'mean' mode: alpha_w = k * mean(|w|), clamp, symmetric uniform quant.
    alpha_w = jnp.maximum(k * jnp.mean(jnp.abs(w)), 1e-12)
    levels = 2.0 ** (nbit - 1) - 1.0
    return jnp.round(jnp.clip(w, -alpha_w, alpha_w) / alpha_w * levels) / levels * alpha_w


def _fold_bn(gamma, beta, running_mean, running_var, eps=1e-5):
    # TODO(synk): BatchNorm implemented in inference mode (running statistics);
    # training-mode batch-statistic computation is not reproduced.
    scale = gamma / jnp.sqrt(running_var + eps)
    bias = beta - running_mean * scale
    return scale, bias


def _weight_tap_major_2d(w_oihw):
    # (P, C, 3, 3) -> (P, 9*C) with column index t*C + c, t = kh*3 + kw
    P, C = w_oihw.shape[0], w_oihw.shape[1]
    return jnp.transpose(w_oihw, (0, 2, 3, 1)).reshape(P, 9 * C)


# ----------------------------------------------------------------------------
# ResNetBasicblock forward (stride=1, downsample=None, wbit=4, abit=4, alpha=10)
# ----------------------------------------------------------------------------
def resnet_basicblock_forward(x_nchw, params, *, wbit=4, abit=4, alpha=10.0, k=2,
                              images_per_step=8):
    # TODO(synk): stride>1 / downsample path not implemented (module defaults: stride=1,
    # downsample=None -> inplanes == planes).
    x = x_nchw.astype(jnp.float32)
    N, C, H, W = x.shape
    P = params["w_a"].shape[0]
    assert C == P, "downsample=None path requires inplanes == planes"
    HW = H * W
    inv_qs = alpha / (2.0 ** abit - 1.0)

    s_a, b_a = _fold_bn(params["g_a"], params["be_a"], params["rm_a"], params["rv_a"])
    s_b, b_b = _fold_bn(params["g_b"], params["be_b"], params["rm_b"], params["rv_b"])

    wa = _quantize_weight_sawb_mean(params["w_a"], wbit, k) * s_a[:, None, None, None]
    wb = (_quantize_weight_sawb_mean(params["w_b"], wbit, k)
          * (s_b * inv_qs)[:, None, None, None])          # fold bn_b scale + stage-a dequant
    wa2 = _weight_tap_major_2d(wa)                         # (P, 9*C)
    wb2 = _weight_tap_major_2d(wb)                         # (P, 9*P)

    # Pack Nb images per grid step along the lane dimension to amortize per-step overhead.
    # TODO(synk): for tiny N on v7x, prefer Nb = ceil(N/2) so both TensorCores get work.
    Nb = max(1, min(images_per_step, N))
    G = -(-N // Nb)
    Npad = G * Nb
    if Npad != N:
        x = jnp.pad(x, ((0, Npad - N), (0, 0), (0, 0), (0, 0)))
    xg = (x.reshape(G, Nb, C, HW)
           .transpose(0, 2, 1, 3)
           .reshape(G, C, Nb * HW))                        # images contiguous along lanes

    out = basicblock_pallas(xg, wa2, b_a.reshape(P, 1), wb2, b_b.reshape(P, 1),
                            HW=HW, W=W, alpha=alpha, abit=abit)

    out = (out.reshape(G, P, Nb, HW)
              .transpose(0, 2, 1, 3)
              .reshape(Npad, P, H, W))
    return out[:N]


# ----------------------------------------------------------------------------
# Pure-JAX reference (no Pallas) for a sanity check
# ----------------------------------------------------------------------------
def _reference_forward(x_nchw, params, *, wbit=4, abit=4, alpha=10.0, k=2):
    def crelu(v):
        qs = (2.0 ** abit - 1.0) / alpha
        return jnp.round(jnp.clip(v, 0.0, alpha) * qs) / qs

    def conv(v_nhwc, w_oihw):
        w_hwio = jnp.transpose(w_oihw, (2, 3, 1, 0))
        return jax.lax.conv_general_dilated(
            v_nhwc, w_hwio, window_strides=(1, 1), padding=((1, 1), (1, 1)),
            dimension_numbers=("NHWC", "HWIO", "NHWC"),
            preferred_element_type=jnp.float32)

    def bn(v, g, be, rm, rv, eps=1e-5):
        return (v - rm) / jnp.sqrt(rv + eps) * g + be

    x = jnp.transpose(x_nchw, (0, 2, 3, 1)).astype(jnp.float32)
    y = conv(x, _quantize_weight_sawb_mean(params["w_a"], wbit, k))
    y = crelu(bn(y, params["g_a"], params["be_a"], params["rm_a"], params["rv_a"]))
    y = conv(y, _quantize_weight_sawb_mean(params["w_b"], wbit, k))
    y = bn(y, params["g_b"], params["be_b"], params["rm_b"], params["rv_b"])
    y = crelu(x + y)
    return jnp.transpose(y, (0, 3, 1, 2))


if __name__ == "__main__":
    key = jax.random.PRNGKey(0)
    ks = jax.random.split(key, 9)
    N, Cin, H, W = 2, 4, 16, 16
    planes = 4                     # stride=1, downsample=None => inplanes == planes

    x = jax.random.normal(ks[0], (N, Cin, H, W), jnp.float32)
    params = {
        "w_a": 0.3 * jax.random.normal(ks[1], (planes, Cin, 3, 3), jnp.float32),
        "w_b": 0.3 * jax.random.normal(ks[2], (planes, planes, 3, 3), jnp.float32),
        "g_a": 1.0 + 0.1 * jax.random.normal(ks[3], (planes,), jnp.float32),
        "be_a": 0.1 * jax.random.normal(ks[4], (planes,), jnp.float32),
        "rm_a": 0.1 * jax.random.normal(ks[5], (planes,), jnp.float32),
        "rv_a": 1.0 + 0.1 * jnp.abs(jax.random.normal(ks[6], (planes,), jnp.float32)),
        "g_b": 1.0 + 0.1 * jax.random.normal(ks[7], (planes,), jnp.float32),
        "be_b": 0.1 * jax.random.normal(ks[8], (planes,), jnp.float32),
        "rm_b": jnp.zeros((planes,), jnp.float32),
        "rv_b": jnp.ones((planes,), jnp.float32),
    }

    out = jax.block_until_ready(resnet_basicblock_forward(x, params))
    ref = jax.block_until_ready(_reference_forward(x, params))

    out_np, ref_np = np.asarray(out), np.asarray(ref)
    step = 10.0 / (2.0 ** 4 - 1.0)          # activation quantization step
    diff = np.abs(out_np - ref_np)

    assert out_np.shape == (N, planes, H, W)
    assert np.isfinite(out_np).all()
    # tiny f32 accumulation-order differences can flip a value across a quantization
    # boundary, so tolerate a small fraction of one-step mismatches.
    assert np.mean(diff) < 0.05, float(np.mean(diff))
    assert np.mean(diff > step + 1e-3) < 0.01, float(np.mean(diff > step + 1e-3))

    print("KERNEL_OK")
</pallas_src>

<mosaic_0001>
module attributes {stable_mosaic.version = 11 : i64} {
  func.func @_basicblock_kernel(%arg0: i32, %arg1: memref<1x4x512xf32, #tpu.memory_space<vmem>>, %arg2: memref<4x36xf32, #tpu.memory_space<vmem>>, %arg3: memref<4x1xf32, #tpu.memory_space<vmem>>, %arg4: memref<4x36xf32, #tpu.memory_space<vmem>>, %arg5: memref<4x1xf32, #tpu.memory_space<vmem>>, %arg6: memref<1x4x512xf32, #tpu.memory_space<vmem>>, %arg7: memref<36x512xf32, #tpu.memory_space<vmem>>) attributes {dimension_semantics = [#tpu.dimension_semantics<parallel>], iteration_bounds = array<i64: 1>, scalar_prefetch = 0 : i64, scratch_operands = 1 : i64, tpu.core_type = #tpu.core_type<tc>, window_params = [{transform_indices = @transform_0, window_bounds = array<i64: 1, 4, 512>}, {pipeline_mode = #tpu.pipeline_mode<synchronous>, transform_indices = @transform_1, window_bounds = array<i64: 4, 36>}, {pipeline_mode = #tpu.pipeline_mode<synchronous>, transform_indices = @transform_2, window_bounds = array<i64: 4, 1>}, {pipeline_mode = #tpu.pipeline_mode<synchronous>, transform_indices = @transform_3, window_bounds = array<i64: 4, 36>}, {pipeline_mode = #tpu.pipeline_mode<synchronous>, transform_indices = @transform_4, window_bounds = array<i64: 4, 1>}, {transform_indices = @transform_5, window_bounds = array<i64: 1, 4, 512>}]} {
    %0 = tpu.iota {dimensions = array<i32: 1>} : vector<1x512xi32>
    %c256_i32 = arith.constant 256 : i32
    %c0_i32 = arith.constant 0 : i32
    %1 = arith.cmpi eq, %c256_i32, %c0_i32 : i32
    %c1_i32 = arith.constant 1 : i32
    %2 = arith.select %1, %c1_i32, %c256_i32 : i32
    %3 = vector.broadcast %2 : i32 to vector<1x512xi32>
    %4 = arith.remsi %0, %3 : vector<1x512xi32>
    %c0_i32_0 = arith.constant 0 : i32
    %5 = vector.broadcast %c0_i32_0 : i32 to vector<1x512xi32>
    %6 = arith.cmpi ne, %4, %5 : vector<1x512xi32>
    %c0_i32_1 = arith.constant 0 : i32
    %7 = vector.broadcast %c0_i32_1 : i32 to vector<1x512xi32>
    %8 = arith.cmpi slt, %4, %7 : vector<1x512xi32>
    %c0_i32_2 = arith.constant 0 : i32
    %9 = arith.cmpi slt, %2, %c0_i32_2 : i32
    %10 = vector.broadcast %9 : i1 to vector<1x512xi1>
    %11 = vector.broadcast %10 : vector<1x512xi1> to vector<1x512xi1>
    %12 = arith.xori %8, %11 : vector<1x512xi1>
    %13 = arith.andi %12, %6 : vector<1x512xi1>
    %14 = vector.broadcast %2 : i32 to vector<1x512xi32>
    %15 = arith.addi %4, %14 : vector<1x512xi32>
    %16 = arith.select %13, %15, %4 : vector<1x512xi1>, vector<1x512xi32>
    %c16_i32 = arith.constant 16 : i32
    %c0_i32_3 = arith.constant 0 : i32
    %17 = arith.cmpi eq, %c16_i32, %c0_i32_3 : i32
    %c1_i32_4 = arith.constant 1 : i32
    %18 = arith.select %17, %c1_i32_4, %c16_i32 : i32
    %19 = vector.broadcast %18 : i32 to vector<1x512xi32>
    %20 = arith.remsi %16, %19 : vector<1x512xi32>
    %c0_i32_5 = arith.constant 0 : i32
    %21 = vector.broadcast %c0_i32_5 : i32 to vector<1x512xi32>
    %22 = arith.cmpi ne, %20, %21 : vector<1x512xi32>
    %c0_i32_6 = arith.constant 0 : i32
    %23 = vector.broadcast %c0_i32_6 : i32 to vector<1x512xi32>
    %24 = arith.cmpi slt, %20, %23 : vector<1x512xi32>
    %c0_i32_7 = arith.constant 0 : i32
    %25 = arith.cmpi slt, %18, %c0_i32_7 : i32
    %26 = vector.broadcast %25 : i1 to vector<1x512xi1>
    %27 = vector.broadcast %26 : vector<1x512xi1> to vector<1x512xi1>
    %28 = arith.xori %24, %27 : vector<1x512xi1>
    %29 = arith.andi %28, %22 : vector<1x512xi1>
    %30 = vector.broadcast %18 : i32 to vector<1x512xi32>
    %31 = arith.addi %20, %30 : vector<1x512xi32>
    %32 = arith.select %29, %31, %20 : vector<1x512xi1>, vector<1x512xi32>
    %c0_i32_8 = arith.constant 0 : i32
    %33 = vector.broadcast %c0_i32_8 : i32 to vector<1x512xi32>
    %34 = arith.cmpi sgt, %32, %33 : vector<1x512xi32>
    %c15_i32 = arith.constant 15 : i32
    %35 = vector.broadcast %c15_i32 : i32 to vector<1x512xi32>
    %36 = arith.cmpi slt, %32, %35 : vector<1x512xi32>
    %c16_i32_9 = arith.constant 16 : i32
    %37 = vector.broadcast %c16_i32_9 : i32 to vector<1x512xi32>
    %38 = arith.cmpi sge, %16, %37 : vector<1x512xi32>
    %c240_i32 = arith.constant 240 : i32
    %39 = vector.broadcast %c240_i32 : i32 to vector<1x512xi32>
    %40 = arith.cmpi slt, %16, %39 : vector<1x512xi32>
    %41 = arith.andi %38, %34 : vector<1x512xi1>
    %42 = arith.extui %41 : vector<1x512xi1> to vector<1x512xi32>
    %43 = arith.sitofp %42 : vector<1x512xi32> to vector<1x512xf32>
    %44 = arith.extui %38 : vector<1x512xi1> to vector<1x512xi32>
    %45 = arith.sitofp %44 : vector<1x512xi32> to vector<1x512xf32>
    %46 = arith.andi %38, %36 : vector<1x512xi1>
    %47 = arith.extui %46 : vector<1x512xi1> to vector<1x512xi32>
    %48 = arith.sitofp %47 : vector<1x512xi32> to vector<1x512xf32>
    %49 = arith.extui %34 : vector<1x512xi1> to vector<1x512xi32>
    %50 = arith.sitofp %49 : vector<1x512xi32> to vector<1x512xf32>
    %51 = arith.extui %36 : vector<1x512xi1> to vector<1x512xi32>
    %52 = arith.sitofp %51 : vector<1x512xi32> to vector<1x512xf32>
    %53 = arith.andi %40, %34 : vector<1x512xi1>
    %54 = arith.extui %53 : vector<1x512xi1> to vector<1x512xi32>
    %55 = arith.sitofp %54 : vector<1x512xi32> to vector<1x512xf32>
    %56 = arith.extui %40 : vector<1x512xi1> to vector<1x512xi32>
    %57 = arith.sitofp %56 : vector<1x512xi32> to vector<1x512xf32>
    %58 = arith.andi %40, %36 : vector<1x512xi1>
    %59 = arith.extui %58 : vector<1x512xi1> to vector<1x512xi32>
    %60 = arith.sitofp %59 : vector<1x512xi32> to vector<1x512xf32>
    %c0 = arith.constant 0 : index
    %c0_10 = arith.constant 0 : index
    %c0_11 = arith.constant 0 : index
    %61 = vector.load %arg1[%c0, %c0_10, %c0_11] : memref<1x4x512xf32, #tpu.memory_space<vmem>>, vector<1x4x512xf32>
    %62 = vector.shape_cast %61 : vector<1x4x512xf32> to vector<4x512xf32>
    %c17_i32 = arith.constant 17 : i32
    %63 = tpu.dynamic_rotate %62 by %c17_i32 dim 1 : vector<4x512xf32>, i32 -> vector<4x512xf32>
    %64 = vector.broadcast %43 : vector<1x512xf32> to vector<4x512xf32>
    %65 = arith.mulf %63, %64 : vector<4x512xf32>
    %c0_12 = arith.constant 0 : index
    %c0_13 = arith.constant 0 : index
    %66 = vector.load %arg7[%c0_12, %c0_13] : memref<36x512xf32, #tpu.memory_space<vmem>>, vector<4x512xf32>
    tpu.vector_store %arg7[%c0_12, %c0_13], %65 {strides = array<i32>} : memref<36x512xf32, #tpu.memory_space<vmem>>, vector<4x512xf32>,
    %c16_i32_14 = arith.constant 16 : i32
    %67 = tpu.dynamic_rotate %62 by %c16_i32_14 dim 1 : vector<4x512xf32>, i32 -> vector<4x512xf32>
    %68 = vector.broadcast %45 : vector<1x512xf32> to vector<4x512xf32>
    %69 = arith.mulf %67, %68 : vector<4x512xf32>
    %c4 = arith.constant 4 : index
    %c0_15 = arith.constant 0 : index
    %70 = vector.load %arg7[%c4, %c0_15] : memref<36x512xf32, #tpu.memory_space<vmem>>, vector<4x512xf32>
    tpu.vector_store %arg7[%c4, %c0_15], %69 {strides = array<i32>} : memref<36x512xf32, #tpu.memory_space<vmem>>, vector<4x512xf32>,
    %c15_i32_16 = arith.constant 15 : i32
    %71 = tpu.dynamic_rotate %62 by %c15_i32_16 dim 1 : vector<4x512xf32>, i32 -> vector<4x512xf32>
    %72 = vector.broadcast %48 : vector<1x512xf32> to vector<4x512xf32>
    %73 = arith.mulf %71, %72 : vector<4x512xf32>
    %c8 = arith.constant 8 : index
    %c0_17 = arith.constant 0 : index
    %74 = vector.load %arg7[%c8, %c0_17] : memref<36x512xf32, #tpu.memory_space<vmem>>, vector<4x512xf32>
    tpu.vector_store %arg7[%c8, %c0_17], %73 {strides = array<i32>} : memref<36x512xf32, #tpu.memory_space<vmem>>, vector<4x512xf32>,
    %c1_i32_18 = arith.constant 1 : i32
    %75 = tpu.dynamic_rotate %62 by %c1_i32_18 dim 1 : vector<4x512xf32>, i32 -> vector<4x512xf32>
    %76 = vector.broadcast %50 : vector<1x512xf32> to vector<4x512xf32>
    %77 = arith.mulf %75, %76 : vector<4x512xf32>
    %c12 = arith.constant 12 : index
    %c0_19 = arith.constant 0 : index
    %78 = vector.load %arg7[%c12, %c0_19] : memref<36x512xf32, #tpu.memory_space<vmem>>, vector<4x512xf32>
    tpu.vector_store %arg7[%c12, %c0_19], %77 {strides = array<i32>} : memref<36x512xf32, #tpu.memory_space<vmem>>, vector<4x512xf32>,
    %c16 = arith.constant 16 : index
    %c0_20 = arith.constant 0 : index
    %79 = vector.load %arg7[%c16, %c0_20] : memref<36x512xf32, #tpu.memory_space<vmem>>, vector<4x512xf32>
    tpu.vector_store %arg7[%c16, %c0_20], %62 {strides = array<i32>} : memref<36x512xf32, #tpu.memory_space<vmem>>, vector<4x512xf32>,
    %c511_i32 = arith.constant 511 : i32
    %80 = tpu.dynamic_rotate %62 by %c511_i32 dim 1 : vector<4x512xf32>, i32 -> vector<4x512xf32>
    %81 = vector.broadcast %52 : vector<1x512xf32> to vector<4x512xf32>
    %82 = arith.mulf %80, %81 : vector<4x512xf32>
    %c20 = arith.constant 20 : index
    %c0_21 = arith.constant 0 : index
    %83 = vector.load %arg7[%c20, %c0_21] : memref<36x512xf32, #tpu.memory_space<vmem>>, vector<4x512xf32>
    tpu.vector_store %arg7[%c20, %c0_21], %82 {strides = array<i32>} : memref<36x512xf32, #tpu.memory_space<vmem>>, vector<4x512xf32>,
    %c497_i32 = arith.constant 497 : i32
    %84 = tpu.dynamic_rotate %62 by %c497_i32 dim 1 : vector<4x512xf32>, i32 -> vector<4x512xf32>
    %85 = vector.broadcast %55 : vector<1x512xf32> to vector<4x512xf32>
    %86 = arith.mulf %84, %85 : vector<4x512xf32>
    %c24 = arith.constant 24 : index
    %c0_22 = arith.constant 0 : index
    %87 = vector.load %arg7[%c24, %c0_22] : memref<36x512xf32, #tpu.memory_space<vmem>>, vector<4x512xf32>
    tpu.vector_store %arg7[%c24, %c0_22], %86 {strides = array<i32>} : memref<36x512xf32, #tpu.memory_space<vmem>>, vector<4x512xf32>,
    %c496_i32 = arith.constant 496 : i32
    %88 = tpu.dynamic_rotate %62 by %c496_i32 dim 1 : vector<4x512xf32>, i32 -> vector<4x512xf32>
    %89 = vector.broadcast %57 : vector<1x512xf32> to vector<4x512xf32>
    %90 = arith.mulf %88, %89 : vector<4x512xf32>
    %c28 = arith.constant 28 : index
    %c0_23 = arith.constant 0 : index
    %91 = vector.load %arg7[%c28, %c0_23] : memref<36x512xf32, #tpu.memory_space<vmem>>, vector<4x512xf32>
    tpu.vector_store %arg7[%c28, %c0_23], %90 {strides = array<i32>} : memref<36x512xf32, #tpu.memory_space<vmem>>, vector<4x512xf32>,
    %c495_i32 = arith.constant 495 : i32
    %92 = tpu.dynamic_rotate %62 by %c495_i32 dim 1 : vector<4x512xf32>, i32 -> vector<4x512xf32>
    %93 = vector.broadcast %60 : vector<1x512xf32> to vector<4x512xf32>
    %94 = arith.mulf %92, %93 : vector<4x512xf32>
    %c32 = arith.constant 32 : index
    %c0_24 = arith.constant 0 : index
    %95 = vector.load %arg7[%c32, %c0_24] : memref<36x512xf32, #tpu.memory_space<vmem>>, vector<4x512xf32>
    tpu.vector_store %arg7[%c32, %c0_24], %94 {strides = array<i32>} : memref<36x512xf32, #tpu.memory_space<vmem>>, vector<4x512xf32>,
    %c0_25 = arith.constant 0 : index
    %c0_26 = arith.constant 0 : index
    %96 = vector.load %arg2[%c0_25, %c0_26] : memref<4x36xf32, #tpu.memory_space<vmem>>, vector<4x36xf32>
    %c0_27 = arith.constant 0 : index
    %c0_28 = arith.constant 0 : index
    %97 = vector.load %arg7[%c0_27, %c0_28] : memref<36x512xf32, #tpu.memory_space<vmem>>, vector<36x512xf32>
    %cst = arith.constant dense<0.000000e+00> : vector<4x512xf32>
    %98 = tpu.matmul %96, %97, %cst {dimension_numbers = #tpu.dot_dimension_numbers<[1], [0], [0], [1], [0, 0, 1, 1], [], []>} : vector<4x36xf32>, vector<36x512xf32>, vector<4x512xf32> -> vector<4x512xf32>
    %c0_29 = arith.constant 0 : index
    %c0_30 = arith.constant 0 : index
    %99 = vector.load %arg3[%c0_29, %c0_30] : memref<4x1xf32, #tpu.memory_space<vmem>>, vector<4x1xf32>
    %100 = vector.broadcast %99 : vector<4x1xf32> to vector<4x512xf32>
    %101 = arith.addf %98, %100 : vector<4x512xf32>
    %cst_31 = arith.constant 0.000000e+00 : f32
    %cst_32 = arith.constant 1.000000e+01 : f32
    %102 = vector.broadcast %cst_31 : f32 to vector<4x512xf32>
    %103 = arith.maximumf %102, %101 : vector<4x512xf32>
    %104 = vector.broadcast %cst_32 : f32 to vector<4x512xf32>
    %105 = arith.minimumf %104, %103 : vector<4x512xf32>
    %cst_33 = arith.constant 1.500000e+00 : f32
    %106 = vector.broadcast %cst_33 : f32 to vector<4x512xf32>
    %107 = arith.mulf %105, %106 : vector<4x512xf32>
    %108 = math.roundeven %107 : vector<4x512xf32>
    %c17_i32_34 = arith.constant 17 : i32
    %109 = tpu.dynamic_rotate %108 by %c17_i32_34 dim 1 : vector<4x512xf32>, i32 -> vector<4x512xf32>
    %110 = vector.broadcast %43 : vector<1x512xf32> to vector<4x512xf32>
    %111 = arith.mulf %109, %110 : vector<4x512xf32>
    %c0_35 = arith.constant 0 : index
    %c0_36 = arith.constant 0 : index
    %112 = vector.load %arg7[%c0_35, %c0_36] : memref<36x512xf32, #tpu.memory_space<vmem>>, vector<4x512xf32>
    tpu.vector_store %arg7[%c0_35, %c0_36], %111 {strides = array<i32>} : memref<36x512xf32, #tpu.memory_space<vmem>>, vector<4x512xf32>,
    %c16_i32_37 = arith.constant 16 : i32
    %113 = tpu.dynamic_rotate %108 by %c16_i32_37 dim 1 : vector<4x512xf32>, i32 -> vector<4x512xf32>
    %114 = vector.broadcast %45 : vector<1x512xf32> to vector<4x512xf32>
    %115 = arith.mulf %113, %114 : vector<4x512xf32>
    %c4_38 = arith.constant 4 : index
    %c0_39 = arith.constant 0 : index
    %116 = vector.load %arg7[%c4_38, %c0_39] : memref<36x512xf32, #tpu.memory_space<vmem>>, vector<4x512xf32>
    tpu.vector_store %arg7[%c4_38, %c0_39], %115 {strides = array<i32>} : memref<36x512xf32, #tpu.memory_space<vmem>>, vector<4x512xf32>,
    %c15_i32_40 = arith.constant 15 : i32
    %117 = tpu.dynamic_rotate %108 by %c15_i32_40 dim 1 : vector<4x512xf32>, i32 -> vector<4x512xf32>
    %118 = vector.broadcast %48 : vector<1x512xf32> to vector<4x512xf32>
    %119 = arith.mulf %117, %118 : vector<4x512xf32>
    %c8_41 = arith.constant 8 : index
    %c0_42 = arith.constant 0 : index
    %120 = vector.load %arg7[%c8_41, %c0_42] : memref<36x512xf32, #tpu.memory_space<vmem>>, vector<4x512xf32>
    tpu.vector_store %arg7[%c8_41, %c0_42], %119 {strides = array<i32>} : memref<36x512xf32, #tpu.memory_space<vmem>>, vector<4x512xf32>,
    %c1_i32_43 = arith.constant 1 : i32
    %121 = tpu.dynamic_rotate %108 by %c1_i32_43 dim 1 : vector<4x512xf32>, i32 -> vector<4x512xf32>
    %122 = vector.broadcast %50 : vector<1x512xf32> to vector<4x512xf32>
    %123 = arith.mulf %121, %122 : vector<4x512xf32>
    %c12_44 = arith.constant 12 : index
    %c0_45 = arith.constant 0 : index
    %124 = vector.load %arg7[%c12_44, %c0_45] : memref<36x512xf32, #tpu.memory_space<vmem>>, vector<4x512xf32>
    tpu.vector_store %arg7[%c12_44, %c0_45], %123 {strides = array<i32>} : memref<36x512xf32, #tpu.memory_space<vmem>>, vector<4x512xf32>,
    %c16_46 = arith.constant 16 : index
    %c0_47 = arith.constant 0 : index
    %125 = vector.load %arg7[%c16_46, %c0_47] : memref<36x512xf32, #tpu.memory_space<vmem>>, vector<4x512xf32>
    tpu.vector_store %arg7[%c16_46, %c0_47], %108 {strides = array<i32>} : memref<36x512xf32, #tpu.memory_space<vmem>>, vector<4x512xf32>,
    %c511_i32_48 = arith.constant 511 : i32
    %126 = tpu.dynamic_rotate %108 by %c511_i32_48 dim 1 : vector<4x512xf32>, i32 -> vector<4x512xf32>
    %127 = vector.broadcast %52 : vector<1x512xf32> to vector<4x512xf32>
    %128 = arith.mulf %126, %127 : vector<4x512xf32>
    %c20_49 = arith.constant 20 : index
    %c0_50 = arith.constant 0 : index
    %129 = vector.load %arg7[%c20_49, %c0_50] : memref<36x512xf32, #tpu.memory_space<vmem>>, vector<4x512xf32>
    tpu.vector_store %arg7[%c20_49, %c0_50], %128 {strides = array<i32>} : memref<36x512xf32, #tpu.memory_space<vmem>>, vector<4x512xf32>,
    %c497_i32_51 = arith.constant 497 : i32
    %130 = tpu.dynamic_rotate %108 by %c497_i32_51 dim 1 : vector<4x512xf32>, i32 -> vector<4x512xf32>
    %131 = vector.broadcast %55 : vector<1x512xf32> to vector<4x512xf32>
    %132 = arith.mulf %130, %131 : vector<4x512xf32>
    %c24_52 = arith.constant 24 : index
    %c0_53 = arith.constant 0 : index
    %133 = vector.load %arg7[%c24_52, %c0_53] : memref<36x512xf32, #tpu.memory_space<vmem>>, vector<4x512xf32>
    tpu.vector_store %arg7[%c24_52, %c0_53], %132 {strides = array<i32>} : memref<36x512xf32, #tpu.memory_space<vmem>>, vector<4x512xf32>,
    %c496_i32_54 = arith.constant 496 : i32
    %134 = tpu.dynamic_rotate %108 by %c496_i32_54 dim 1 : vector<4x512xf32>, i32 -> vector<4x512xf32>
    %135 = vector.broadcast %57 : vector<1x512xf32> to vector<4x512xf32>
    %136 = arith.mulf %134, %135 : vector<4x512xf32>
    %c28_55 = arith.constant 28 : index
    %c0_56 = arith.constant 0 : index
    %137 = vector.load %arg7[%c28_55, %c0_56] : memref<36x512xf32, #tpu.memory_space<vmem>>, vector<4x512xf32>
    tpu.vector_store %arg7[%c28_55, %c0_56], %136 {strides = array<i32>} : memref<36x512xf32, #tpu.memory_space<vmem>>, vector<4x512xf32>,
    %c495_i32_57 = arith.constant 495 : i32
    %138 = tpu.dynamic_rotate %108 by %c495_i32_57 dim 1 : vector<4x512xf32>, i32 -> vector<4x512xf32>
    %139 = vector.broadcast %60 : vector<1x512xf32> to vector<4x512xf32>
    %140 = arith.mulf %138, %139 : vector<4x512xf32>
    %c32_58 = arith.constant 32 : index
    %c0_59 = arith.constant 0 : index
    %141 = vector.load %arg7[%c32_58, %c0_59] : memref<36x512xf32, #tpu.memory_space<vmem>>, vector<4x512xf32>
    tpu.vector_store %arg7[%c32_58, %c0_59], %140 {strides = array<i32>} : memref<36x512xf32, #tpu.memory_space<vmem>>, vector<4x512xf32>,
    %c0_60 = arith.constant 0 : index
    %c0_61 = arith.constant 0 : index
    %142 = vector.load %arg4[%c0_60, %c0_61] : memref<4x36xf32, #tpu.memory_space<vmem>>, vector<4x36xf32>
    %c0_62 = arith.constant 0 : index
    %c0_63 = arith.constant 0 : index
    %143 = vector.load %arg7[%c0_62, %c0_63] : memref<36x512xf32, #tpu.memory_space<vmem>>, vector<36x512xf32>
    %cst_64 = arith.constant dense<0.000000e+00> : vector<4x512xf32>
    %144 = tpu.matmul %142, %143, %cst_64 {dimension_numbers = #tpu.dot_dimension_numbers<[1], [0], [0], [1], [0, 0, 1, 1], [], []>} : vector<4x36xf32>, vector<36x512xf32>, vector<4x512xf32> -> vector<4x512xf32>
    %c0_65 = arith.constant 0 : index
    %c0_66 = arith.constant 0 : index
    %145 = vector.load %arg5[%c0_65, %c0_66] : memref<4x1xf32, #tpu.memory_space<vmem>>, vector<4x1xf32>
    %146 = vector.broadcast %145 : vector<4x1xf32> to vector<4x512xf32>
    %147 = arith.addf %144, %146 : vector<4x512xf32>
    %148 = arith.addf %147, %62 : vector<4x512xf32>
    %cst_67 = arith.constant 0.000000e+00 : f32
    %cst_68 = arith.constant 1.000000e+01 : f32
    %149 = vector.broadcast %cst_67 : f32 to vector<4x512xf32>
    %150 = arith.maximumf %149, %148 : vector<4x512xf32>
    %151 = vector.broadcast %cst_68 : f32 to vector<4x512xf32>
    %152 = arith.minimumf %151, %150 : vector<4x512xf32>
    %cst_69 = arith.constant 1.500000e+00 : f32
    %153 = vector.broadcast %cst_69 : f32 to vector<4x512xf32>
    %154 = arith.mulf %152, %153 : vector<4x512xf32>
    %155 = math.roundeven %154 : vector<4x512xf32>
    %cst_70 = arith.constant 0.666666686 : f32
    %156 = vector.broadcast %cst_70 : f32 to vector<4x512xf32>
    %157 = arith.mulf %155, %156 : vector<4x512xf32>
    %c0_71 = arith.constant 0 : index
    %c0_72 = arith.constant 0 : index
    %c0_73 = arith.constant 0 : index
    %158 = vector.load %arg6[%c0_71, %c0_72, %c0_73] : memref<1x4x512xf32, #tpu.memory_space<vmem>>, vector<1x4x512xf32>
    %159 = vector.shape_cast %158 : vector<1x4x512xf32> to vector<4x512xf32>
    %160 = vector.shape_cast %157 : vector<4x512xf32> to vector<1x4x512xf32>
    tpu.vector_store %arg6[%c0_71, %c0_72, %c0_73], %160 {strides = array<i32>} : memref<1x4x512xf32, #tpu.memory_space<vmem>>, vector<1x4x512xf32>,
    return
  }
  func.func @transform_0(%arg0: i32) -> (i32, i32, i32) {
    %c0_i32 = arith.constant 0 : i32
    %c0_i32_0 = arith.constant 0 : i32
    %c0_i32_1 = arith.constant 0 : i32
    return %arg0, %c0_i32, %c0_i32_0 : i32, i32, i32
  }
  func.func @transform_1(%arg0: i32) -> (i32, i32) {
    %c0_i32 = arith.constant 0 : i32
    %c0_i32_0 = arith.constant 0 : i32
    %c0_i32_1 = arith.constant 0 : i32
    return %c0_i32, %c0_i32_0 : i32, i32
  }
  func.func @transform_2(%arg0: i32) -> (i32, i32) {
    %c0_i32 = arith.constant 0 : i32
    %c0_i32_0 = arith.constant 0 : i32
    %c0_i32_1 = arith.constant 0 : i32
    return %c0_i32, %c0_i32_0 : i32, i32
  }
  func.func @transform_3(%arg0: i32) -> (i32, i32) {
    %c0_i32 = arith.constant 0 : i32
    %c0_i32_0 = arith.constant 0 : i32
    %c0_i32_1 = arith.constant 0 : i32
    return %c0_i32, %c0_i32_0 : i32, i32
  }
  func.func @transform_4(%arg0: i32) -> (i32, i32) {
    %c0_i32 = arith.constant 0 : i32
    %c0_i32_0 = arith.constant 0 : i32
    %c0_i32_1 = arith.constant 0 : i32
    return %c0_i32, %c0_i32_0 : i32, i32
  }
  func.func @transform_5(%arg0: i32) -> (i32, i32, i32) {
    %c0_i32 = arith.constant 0 : i32
    %c0_i32_0 = arith.constant 0 : i32
    %c0_i32_1 = arith.constant 0 : i32
    return %arg0, %c0_i32, %c0_i32_0 : i32, i32, i32
  }
}

</mosaic_0001>

<bundles_post_ra>
// kernel: tpu_custom_call.1
= control target key start
LH: loop header
LB: loop body
LE: loop exit
PB: predicated region body
PF: predicated region fallthrough
CT: control target
= control target key end

     0   :  { %10 = vsyncpa [#allocation4], 0  ;;  %s1841_s0 = inlined_call_operand.hbm [shape: f32[1,4,512], index: 0, kind: input, shape index: {}]   ;;  %s1842_s1 = inlined_call_operand.vmem [shape: f32[4,36], index: 1, kind: input, shape index: {}]   ;;  %s1843_s2 = inlined_call_operand.vmem [shape: f32[4,1], index: 2, kind: input, shape index: {}]   ;;  %s1844_s3 = inlined_call_operand.vmem [shape: f32[4,36], index: 3, kind: input, shape index: {}]   ;;  %s1845_s4 = inlined_call_operand.vmem [shape: f32[4,1], index: 4, kind: input, shape index: {}]   ;;  %s1846_s5 = inlined_call_operand.hbm [shape: f32[1,4,512], index: 5, kind: output, shape index: {}]  }
   0x1   :  { %11 = vsyncpa [#allocation5], 0  ;;  %s1268_s18 = smov [#allocation3]  }
   0x2   :  { %s18_s19 = sshll.u32 %s1268_s18, 4  ;;  %s19_s19 = int_to_ptr.vmem [resolvable:$true] %s18_s19 }
   0x3   :  { %s1232_s20 = scalar_lea.vmem %s19_s19, 256  ;;  %p1237_p1 = scmp.lt.s32.totalorder %s19_s19, %s19_s19 }
   0x4   :  { %p1233_p0 = scmp.ne.s32.totalorder %s19_s19, %s1232_s20  ;;  %p1238_p2 = scmp.lt.s32.totalorder %s1232_s20, %s1232_s20 }
   0x6   :  { %p1239_p3 = por %p1238_p2, %p1237_p1 }
   0x8   :  { %p1240_p4 = pnand %p1239_p3, %p1233_p0 }
   0xa   :  { %1243 = shalt.err (!%p1240_p4)
}
   0xb   :  { %21 = dma.hbm_to_vmem [thread:$0]  %s1841_s0, 256, %s19_s19, [#allocation4]  }
   0xc   :  { %1264 = dma.done.wait [#allocation4], 256  }
   0xd   :  { %1265 = vsyncadd [#allocation4], 4294967040  ;;  %v1269_v0 = vmov 0.0   ;;  %v1315_v1 = vld [vmem:[#allocation3 + $0x8] sm:$0xff]  ;;  %v1317_v2 = vld [vmem:[#allocation3] sm:$0xff]  ;;  %s1270_s23 = smov 112   ;;  %v33_v7 = vlaneseq }
   0xe   :  { %566 = vmatprep.mubr.f32.mxu0 %v1269_v0  ;;  %637 = vmatprep.mubr.f32.mxu1 %v1269_v0  ;;  %348 = vst [vmem:[#allocation2 + $0x28] sm:$0xf] %v1315_v1  ;;  %346 = vst [vmem:[#allocation2 + $0x8] sm:$0xf] %v1317_v2  ;;  %v1327_v3 = vcombine.high %v1315_v1, %v1315_v1  ;;  %v1331_v4 = vcombine.high %v1317_v2, %v1317_v2  ;;  %s1271_s0 = smov 111   ;;  %s1272_s24 = smov 127  }
   0xf   :  { %408 = vrot.lane.b32.xlu1 %v1315_v1, %s1270_s23  ;;  %404 = vrot.lane.b32.xlu0 %v1317_v2, %s1270_s23  ;;  %s1273_s25 = smov 113   ;;  %s1274_s26 = smov 1   ;;  %v1278_v5 = vmov 0   ;;  %v479_v6 = vld [vmem:[%s1843_s2] sm:$0xf]  ;;  %v1398_v8 = vand.u32 127, %v33_v7 }
  0x10   :  { %349 = vst [vmem:[#allocation2 + $0x40] sm:$0xf] %v1327_v3  ;;  %347 = vst [vmem:[#allocation2 + $0x88] sm:$0xf] %v1331_v4  ;;  %s1275_s27 = smov 15   ;;  %s1276_s28 = smov 16   ;;  %1221 = vset.pattern.permute.xlu0 %v1278_v5 }
  0x11   :  { %s1277_s29 = smov 17   ;;  %v37_v9 = vadd.s32 384, %v1398_v8  ;;  %v35_v10 = vadd.s32 128, %v1398_v8  ;;  %v42_v12 = vand.u32 255, %v1398_v8  ;;  %v1404_v13 = vadd.s32 256, %v1398_v8 }
  0x12   :  { %vm412_vm1 = vcmp.lt.s32.totalorder %v1398_v8, 112  ;;  %vm445_vm6 = vcmp.lt.s32.totalorder %v1398_v8, 111  ;;  %vm358_vm10 = vcmp.lt.s32.totalorder %v1398_v8, 127  ;;  %vm489_vm13 = vcmask 1043456  }
  0x13   :  { %410 = vrot.lane.b32.xlu1 %v1327_v3, %s1270_s23  ;;  %437 = vrot.lane.b32.xlu0 %v1317_v2, %s1271_s0  ;;  %v63_v11 = vand.u32 255, %v37_v9  ;;  %v49_v14 = vand.u32 255, %v35_v10  ;;  %v1412_v18 = vand.u32 15, %v42_v12  ;;  %v56_v20 = vand.u32 255, %v1404_v13 }
  0x14   :  { %vm391_vm14 = vcmp.lt.s32.totalorder %v1398_v8, 113 }
  0x15   :  { %vm1406_vm0 = vcmp.lt.s32.totalorder %v63_v11, 240  ;;  %v1414_v19 = vand.u32 15, %v63_v11  ;;  %v1417_v21 = vand.u32 15, %v49_v14  ;;  %vm138_vm2 = vcmp.lt.s32.totalorder %v1412_v18, 15 }
  0x16   :  { %v1423_v22 = vsel %vm1406_vm0, 1.0, %v1269_v0  ;;  %vm1426_vm3 = vcmp.lt.s32.totalorder %v49_v14, 240  ;;  %v1433_v26 = vand.u32 15, %v56_v20  ;;  %v1445_v31 = vsel %vm138_vm2, 1.0, %v1269_v0 }
  0x17   :  { %439 = vrot.lane.b32.xlu1 %v1331_v4, %s1271_s0  ;;  %406 = vrot.lane.b32.xlu0 %v1331_v4, %s1270_s23  ;;  %vm141_vm4 = vcmp.lt.s32.totalorder %v1414_v19, 15  ;;  %vm139_vm5 = vcmp.lt.s32.totalorder %v1417_v21, 15  ;;  %v1450_v32 = vsel %vm1426_vm3, 1.0, %v1269_v0  ;;  %vm134_vm11 = vcmp.gt.s32.totalorder %v1412_v18, 0 }
  0x18   :  { %vm221_vm7 = vmand %vm1406_vm0, %vm141_vm4  ;;  %vm140_vm8 = vcmp.lt.s32.totalorder %v1433_v26, 15  ;;  %v1496_v58 = vsel %vm141_vm4, 1.0, %v1269_v0  ;;  %v1501_v59 = vsel %vm139_vm5, 1.0, %v1269_v0  ;;  %vm137_vm12 = vcmp.gt.s32.totalorder %v1414_v19, 0 }
  0x19   :  { %vm219_vm9 = vmand %vm1426_vm3, %vm139_vm5  ;;  %v1470_v42 = vsel %vm221_vm7, 1.0, %v1269_v0  ;;  %v1475_v43 = vsel %vm140_vm8, 1.0, %v1269_v0  ;;  %vm135_vm15 = vcmp.gt.s32.totalorder %v1417_v21, 0  ;;  %v1519_v11 = vsel %vm134_vm11, 1.0, %v1269_v0 }
  0x1a   :  { %v1478_v44 = vsel %vm219_vm9, 1.0, %v1269_v0  ;;  %vm1525_vm4 = vmand %vm1406_vm0, %vm137_vm12  ;;  %vm136_vm5 = vcmp.gt.s32.totalorder %v1433_v26, 0  ;;  %vm1579_vm7 = vcmp.ge.s32.totalorder %v42_v12, 16  ;;  %vm1591_vm9 = vcmp.ge.s32.totalorder %v56_v20, 16 }
  0x1b   :  { %443 = vrot.lane.b32.xlu1 %v1327_v3, %s1271_s0  ;;  %441 = vrot.lane.b32.xlu0 %v1315_v1, %s1271_s0  ;;  %vm199_vm0 = vmand %vm1426_vm3, %vm135_vm15  ;;  %v1549_v25 = vsel %vm136_vm5, 1.0, %v1269_v0  ;;  %vm321_vm3 = vcmp.lt.s32.totalorder %v1398_v8, 1 }
  0x1f   :  { %352 = vrot.lane.b32.xlu1 %v1331_v4, %s1272_s24  ;;  %350 = vrot.lane.b32.xlu0 %v1317_v2, %s1272_s24 }
  0x23   :  { %356 = vrot.lane.b32.xlu1 %v1327_v3, %s1272_s24  ;;  %354 = vrot.lane.b32.xlu0 %v1315_v1, %s1272_s24 }
  0x27   :  { %385 = vrot.lane.b32.xlu1 %v1331_v4, %s1273_s25  ;;  %383 = vrot.lane.b32.xlu0 %v1317_v2, %s1273_s25 }
  0x2b   :  { %389 = vrot.lane.b32.xlu1 %v1327_v3, %s1273_s25  ;;  %387 = vrot.lane.b32.xlu0 %v1315_v1, %s1273_s25 }
  0x2f   :  { %315 = vrot.lane.b32.xlu1 %v1331_v4, %s1274_s26  ;;  %313 = vrot.lane.b32.xlu0 %v1317_v2, %s1274_s26 }
  0x33   :  { %319 = vrot.lane.b32.xlu1 %v1327_v3, %s1274_s26  ;;  %317 = vrot.lane.b32.xlu0 %v1315_v1, %s1274_s26 }
  0x37   :  { %294 = vrot.lane.b32.xlu1 %v1331_v4, %s1275_s27  ;;  %292 = vrot.lane.b32.xlu0 %v1317_v2, %s1275_s27 }
  0x3b   :  { %298 = vrot.lane.b32.xlu1 %v1327_v3, %s1275_s27  ;;  %296 = vrot.lane.b32.xlu0 %v1315_v1, %s1275_s27 }
  0x3f   :  { %261 = vrot.lane.b32.xlu1 %v1331_v4, %s1276_s28  ;;  %259 = vrot.lane.b32.xlu0 %v1317_v2, %s1276_s28 }
  0x43   :  { %265 = vrot.lane.b32.xlu1 %v1327_v3, %s1276_s28  ;;  %263 = vrot.lane.b32.xlu0 %v1315_v1, %s1276_s28 }
  0x47   :  { %240 = vrot.lane.b32.xlu1 %v1331_v4, %s1277_s29  ;;  %238 = vrot.lane.b32.xlu0 %v1317_v2, %s1277_s29 }
  0x4b   :  { %244 = vrot.lane.b32.xlu1 %v1327_v3, %s1277_s29  ;;  %242 = vrot.lane.b32.xlu0 %v1315_v1, %s1277_s29 }
  0x4f   :  { %482 = vperm.xlu0 %1221, %v479_v6  }
  0x81   :  { %v409_v15 = vpop.permute.xlu1 %408  ;;  %v405_v16 = vpop.permute.xlu0 %404 }
  0x85   :  { %v411_v23 = vpop.permute.xlu1 %410  ;;  %v438_v24 = vpop.permute.xlu0 %437 }
  0x86   :  { %v413_v27 = vsel %vm412_vm1, %v409_v15, %v411_v23  ;;  %v416_v28 = vsel %vm412_vm1, %v411_v23, %v405_v16 }
  0x87   :  { %v420_v29 = vmul.f32 %v1423_v22, %v416_v28  ;;  %v427_v30 = vrot.slane %v413_v27, 4 }
  0x89   :  { %v428_v33 = vrot.slane %v420_v29, 4  ;;  %435 = vst [vmem:[#allocation2 + $0x98] sm:$0xf0] %v427_v30  ;;  %v440_v34 = vpop.permute.xlu1 %439  ;;  %v407_v35 = vpop.permute.xlu0 %406 }
  0x8a   :  { %v448_v36 = vsel %vm445_vm6, %v438_v24, %v440_v34  ;;  %v414_v37 = vsel %vm412_vm1, %v407_v35, %v409_v15  ;;  %v415_v38 = vsel %vm412_vm1, %v405_v16, %v407_v35  ;;  %v1544_v35 = vsel %vm1525_vm4, 1.0, %v1269_v0  ;;  %vm1611_vm4 = vmand %vm1591_vm9, %vm140_vm8 }
  0x8b   :  { %436 = vst [vmem:[#allocation2 + $0x60] sm:$0xf0] %v428_v33  ;;  %v450_v39 = vmul.f32 %v1445_v31, %v448_v36  ;;  %v418_v40 = vmul.f32 %v1450_v32, %v414_v37  ;;  %v425_v41 = vrot.slane %v415_v38, 4  ;;  %v1552_v36 = vsel %vm199_vm0, 1.0, %v1269_v0  ;;  %vm1663_vm0 = vmand %vm1579_vm7, %vm134_vm11 }
  0x8c   :  { %vm246_vm8 = vcmp.lt.s32.totalorder %v1398_v8, 17  ;;  %vm485_vm11 = vcmask 293888  }
  0x8d   :  { %454 = vst [vmem:[#allocation2 + $0x20] sm:$0xf] %v450_v39  ;;  %v426_v45 = vrot.slane %v418_v40, 4  ;;  %433 = vst [vmem:[#allocation2 + $0x58] sm:$0xf0] %v425_v41  ;;  %v444_v46 = vpop.permute.xlu1 %443  ;;  %v442_v47 = vpop.permute.xlu0 %441 }
  0x8e   :  { %v449_v48 = vsel %vm445_vm6, %v444_v46, %v438_v24  ;;  %v446_v49 = vsel %vm445_vm6, %v442_v47, %v444_v46  ;;  %v447_v50 = vsel %vm445_vm6, %v440_v34, %v442_v47 }
  0x8f   :  { %434 = vst [vmem:[#allocation2 + $0x10] sm:$0xf0] %v426_v45  ;;  %v453_v51 = vmul.f32 %v1470_v42, %v449_v48  ;;  %v451_v52 = vmul.f32 %v1478_v44, %v447_v50  ;;  %v452_v53 = vmul.f32 %v1475_v43, %v446_v49  ;;  %v1567_v48 = vsel %vm135_vm15, 1.0, %v1269_v0  ;;  %vm1603_vm15 = vmand %vm1579_vm7, %vm138_vm2 }
  0x90   :  { %vm267_vm2 = vcmp.lt.s32.totalorder %v1398_v8, 16 }
  0x91   :  { %457 = vst [vmem:[#allocation2 + $0x90] sm:$0xf] %v453_v51  ;;  %455 = vst [vmem:[#allocation2 + $0x48] sm:$0xf] %v451_v52  ;;  %v353_v54 = vpop.permute.xlu1 %352  ;;  %v351_v55 = vpop.permute.xlu0 %350 }
  0x92   :  { %456 = vst [vmem:[#allocation2 + $0x70] sm:$0xf] %v452_v53  ;;  %v361_v56 = vsel %vm358_vm10, %v351_v55, %v353_v54  ;;  %v1575_v53 = vsel %vm137_vm12, 1.0, %v1269_v0  ;;  %vm300_vm12 = vcmp.lt.s32.totalorder %v1398_v8, 15 }
  0x93   :  { %v363_v57 = vmul.f32 %v1445_v31, %v361_v56 }
  0x94   :  { %v475_v33 = vld [vmem:[#allocation2 + $0x20] sm:$0xf] }
  0x95   :  { %v371_v60 = vrot.slane %v363_v57, 4  ;;  %v357_v61 = vpop.permute.xlu1 %356  ;;  %v355_v62 = vpop.permute.xlu0 %354 }
  0x96   :  { %v362_v63 = vsel %vm358_vm10, %v357_v61, %v351_v55  ;;  %v359_v5 = vsel %vm358_vm10, %v355_v62, %v357_v61  ;;  %v360_v6 = vsel %vm358_vm10, %v353_v54, %v355_v62 }
  0x97   :  { %379 = vst [vmem:[#allocation2 + $0x8] sm:$0xf0] %v371_v60  ;;  %v366_v7 = vmul.f32 %v1496_v58, %v362_v63  ;;  %v364_v9 = vmul.f32 %v1501_v59, %v360_v6  ;;  %v365_v10 = vmul.f32 %v1475_v43, %v359_v5 }
  0x98   :  { %v478_v15 = vld [vmem:[#allocation2 + $0x90] sm:$0xf]  ;;  %v476_v16 = vld [vmem:[#allocation2 + $0x48] sm:$0xf] }
  0x99   :  { %v477_v23 = vld [vmem:[#allocation2 + $0x70] sm:$0xf]  ;;  %v374_v24 = vrot.slane %v366_v7, 4  ;;  %v372_v27 = vrot.slane %v364_v9, 4  ;;  %v373_v28 = vrot.slane %v365_v10, 4  ;;  %1136 = vmatprep.subr.msk.mxu1 %vm489_vm13, %v478_v15  ;;  %v386_v29 = vpop.permute.xlu1 %385  ;;  %1133 = vmatprep.subr.msk.mxu0 %vm489_vm13, %v476_v16  ;;  %v384_v30 = vpop.permute.xlu0 %383 }
  0x9a   :  { %v394_v17 = vsel %vm391_vm14, %v384_v30, %v386_v29  ;;  %1134 = vmatpush1.msk.msra.mxu0 %vm489_vm13, %v475_v33  ;;  %1137 = vmatpush1.msk.msra.mxu1 %vm489_vm13, %v477_v23  ;;  %v1677_v23 = vsel %vm1663_vm0, 1.0, %v1269_v0 }
  0x9b   :  { %382 = vst [vmem:[#allocation2 + $0x40] sm:$0xf0] %v374_v24  ;;  %380 = vst [vmem:[#allocation2 + $0x88] sm:$0xf0] %v372_v27  ;;  %v396_v34 = vmul.f32 %v1519_v11, %v394_v17  ;;  %v1621_v17 = vsel %vm1603_vm15, 1.0, %v1269_v0 }
  0x9c   :  { %381 = vst [vmem:[#allocation2 + $0x28] sm:$0xf0] %v373_v28  ;;  %vm152_vm15 = vmand %vm1591_vm9, %vm136_vm5 }
  0x9d   :  { %400 = vst [vmem:[#allocation2 + $0x58] sm:$0xf] %v396_v34  ;;  %v390_v37 = vpop.permute.xlu1 %389  ;;  %v388_v38 = vpop.permute.xlu0 %387  ;;  %v1626_v34 = vsel %vm1611_vm4, 1.0, %v1269_v0 }
  0x9e   :  { %v395_v39 = vsel %vm391_vm14, %v390_v37, %v384_v30  ;;  %v392_v40 = vsel %vm391_vm14, %v388_v38, %v390_v37  ;;  %v393_v41 = vsel %vm391_vm14, %v386_v29, %v388_v38  ;;  %v467_v30 = vld [vmem:[#allocation2 + $0x8] sm:$0xff] }
  0x9f   :  { %v399_v45 = vmul.f32 %v1544_v35, %v395_v39  ;;  %v397_v46 = vmul.f32 %v1552_v36, %v393_v41  ;;  %v398_v47 = vmul.f32 %v1549_v25, %v392_v40 }
  0xa1   :  { %403 = vst [vmem:[#allocation2 + $0x60] sm:$0xf] %v399_v45  ;;  %401 = vst [vmem:[#allocation2 + $0x10] sm:$0xf] %v397_v46  ;;  %v316_v49 = vpop.permute.xlu1 %315  ;;  %v314_v50 = vpop.permute.xlu0 %313 }
  0xa2   :  { %402 = vst [vmem:[#allocation2 + $0x98] sm:$0xf] %v398_v47  ;;  %v324_v51 = vsel %vm321_vm3, %v314_v50, %v316_v49  ;;  %v468_v27 = vld [vmem:[#allocation2 + $0x88] sm:$0xff]  ;;  %v470_v28 = vld [vmem:[#allocation2 + $0x40] sm:$0xff] }
  0xa3   :  { %v327_v52 = vmul.f32 %v1567_v48, %v324_v51  ;;  %v469_v33 = vld [vmem:[#allocation2 + $0x28] sm:$0xff] }
  0xa4   :  { %v471_v16 = vld [vmem:[#allocation2 + $0x58] sm:$0xff] }
  0xa5   :  { %v335_v54 = vrot.slane %v327_v52, 4  ;;  %v320_v55 = vpop.permute.xlu1 %319  ;;  %v318_v56 = vpop.permute.xlu0 %317 }
  0xa6   :  { %v325_v57 = vsel %vm321_vm3, %v320_v55, %v314_v50  ;;  %v322_v60 = vsel %vm321_vm3, %v318_v56, %v320_v55  ;;  %v323_v19 = vsel %vm321_vm3, %v316_v49, %v318_v56  ;;  %v1648_v55 = vsel %vm1591_vm9, 1.0, %v1269_v0 }
  0xa7   :  { %343 = vst [vmem:[#allocation2 + $0x68] sm:$0xf0] %v335_v54  ;;  %v326_v12 = vmul.f32 %v1519_v11, %v325_v57  ;;  %v328_v62 = vmul.f32 %v1549_v25, %v323_v19  ;;  %v329_v63 = vmul.f32 %v1575_v53, %v322_v60  ;;  %v1643_v54 = vsel %vm1579_vm7, 1.0, %v1269_v0 }
  0xa8   :  { %v472_v13 = vld [vmem:[#allocation2 + $0x10] sm:$0xff]  ;;  %v474_v20 = vld [vmem:[#allocation2 + $0x60] sm:$0xff] }
  0xa9   :  { %v473_v6 = vld [vmem:[#allocation2 + $0x98] sm:$0xff]  ;;  %v334_v7 = vrot.slane %v326_v12, 4  ;;  %v336_v9 = vrot.slane %v328_v62, 4  ;;  %v337_v10 = vrot.slane %v329_v63, 4  ;;  %v295_v14 = vpop.permute.xlu1 %294  ;;  %526 = vmatprep.subr.mxu0 %v472_v13  ;;  %597 = vmatprep.subr.mxu1 %v474_v20  ;;  %v293_v15 = vpop.permute.xlu0 %292 }
  0xaa   :  { %v303_v24 = vsel %vm300_vm12, %v293_v15, %v295_v14  ;;  %527 = vmatpush1.msra.mxu0 %v471_v16  ;;  %598 = vmatpush1.msra.mxu1 %v473_v6 }
  0xab   :  { %342 = vst [vmem:[#allocation2 + $0x30] sm:$0xf0] %v334_v7  ;;  %344 = vst [vmem:[#allocation2 + $0x78] sm:$0xf0] %v336_v9  ;;  %v306_v29 = vmul.f32 %v1501_v59, %v303_v24  ;;  %528 = vmatprep.subr.mxu0 %v468_v27  ;;  %599 = vmatprep.subr.mxu1 %v470_v28  ;;  %v1680_v24 = vsel %vm152_vm15, 1.0, %v1269_v0 }
  0xac   :  { %345 = vst [vmem:[#allocation2 + $0x80] sm:$0xf0] %v337_v10  ;;  %529 = vmatpush1.msra.mxu0 %v467_v30  ;;  %600 = vmatpush1.msra.mxu1 %v469_v33 }
  0xad   :  { %310 = vst [vmem:[#allocation2 + $0x68] sm:$0xf] %v306_v29  ;;  %v299_v37 = vpop.permute.xlu1 %298  ;;  %v297_v38 = vpop.permute.xlu0 %296 }
  0xae   :  { %v304_v39 = vsel %vm300_vm12, %v299_v37, %v293_v15  ;;  %v301_v40 = vsel %vm300_vm12, %v297_v38, %v299_v37  ;;  %v302_v41 = vsel %vm300_vm12, %v295_v14, %v297_v38 }
  0xaf   :  { %v305_v45 = vmul.f32 %v1621_v17, %v304_v39  ;;  %v307_v46 = vmul.f32 %v1626_v34, %v302_v41  ;;  %v308_v47 = vmul.f32 %v1496_v58, %v301_v40  ;;  %v458_v39 = vld [vmem:[%s1842_s1] sm:$0xf] }
  0xb1   :  { %309 = vst [vmem:[#allocation2 + $0x30] sm:$0xf] %v305_v45  ;;  %311 = vst [vmem:[#allocation2 + $0x78] sm:$0xf] %v307_v46  ;;  %v262_v49 = vpop.permute.xlu1 %261  ;;  %v260_v50 = vpop.permute.xlu0 %259 }
  0xb2   :  { %312 = vst [vmem:[#allocation2 + $0x80] sm:$0xf] %v308_v47  ;;  %v270_v51 = vsel %vm267_vm2, %v260_v50, %v262_v49 }
  0xb3   :  { %v281_v52 = vrot.slane %v270_v51, 4 }
  0xb4   :  { %v464_v56 = vld [vmem:[#allocation2 + $0x68] sm:$0xff] }
  0xb5   :  { %289 = vst [vmem:[#allocation2 + $0x38] sm:$0xf0] %v281_v52  ;;  %v266_v57 = vpop.permute.xlu1 %265  ;;  %v264_v60 = vpop.permute.xlu0 %263  ;;  %530 = vmatprep.subr.mxu0 %v464_v56 }
  0xb6   :  { %v271_v19 = vsel %vm267_vm2, %v266_v57, %v260_v50  ;;  %v268_v12 = vsel %vm267_vm2, %v264_v60, %v266_v57  ;;  %v269_v62 = vsel %vm267_vm2, %v262_v49, %v264_v60 }
  0xb7   :  { %v272_v63 = vmul.f32 %v1643_v54, %v271_v19  ;;  %v274_v5 = vmul.f32 %v1648_v55, %v269_v62  ;;  %v283_v13 = vrot.slane %v268_v12, 4 }
  0xb8   :  { %v463_v7 = vld [vmem:[#allocation2 + $0x30] sm:$0xff]  ;;  %v465_v9 = vld [vmem:[#allocation2 + $0x78] sm:$0xff] }
  0xb9   :  { %v466_v6 = vld [vmem:[#allocation2 + $0x80] sm:$0xff]  ;;  %v280_v10 = vrot.slane %v272_v63, 4  ;;  %v282_v14 = vrot.slane %v274_v5, 4  ;;  %291 = vst [vmem:[#allocation2 + $0x18] sm:$0xf0] %v283_v13  ;;  %v241_v15 = vpop.permute.xlu1 %240  ;;  %v239_v16 = vpop.permute.xlu0 %238  ;;  %531 = vmatpush1.msra.mxu0 %v463_v7 }
  0xba   :  { %601 = vmatprep.subr.mxu1 %v466_v6  ;;  %v249_v18 = vsel %vm246_vm8, %v239_v16, %v241_v15 }
  0xbb   :  { %602 = vmatpush1.msra.mxu1 %v465_v9  ;;  %288 = vst [vmem:[#allocation2] sm:$0xf0] %v280_v10  ;;  %290 = vst [vmem:[#allocation2 + $0x50] sm:$0xf0] %v282_v14  ;;  %v252_v21 = vmul.f32 %v1567_v48, %v249_v18 }
  0xbd   :  { %256 = vst [vmem:[#allocation2 + $0x38] sm:$0xf] %v252_v21  ;;  %v245_v26 = vpop.permute.xlu1 %244  ;;  %v243_v61 = vpop.permute.xlu0 %242 }
  0xbe   :  { %v250_v27 = vsel %vm246_vm8, %v245_v26, %v239_v16  ;;  %v247_v28 = vsel %vm246_vm8, %v243_v61, %v245_v26  ;;  %v248_v29 = vsel %vm246_vm8, %v241_v15, %v243_v61 }
  0xbf   :  { %v251_v30 = vmul.f32 %v1677_v23, %v250_v27  ;;  %v253_v33 = vmul.f32 %v1680_v24, %v248_v29  ;;  %v254_v37 = vmul.f32 %v1575_v53, %v247_v28 }
  0xc1   :  { %255 = vst [vmem:[#allocation2] sm:$0xf] %v251_v30  ;;  %257 = vst [vmem:[#allocation2 + $0x50] sm:$0xf] %v253_v33 }
  0xc2   :  { %258 = vst [vmem:[#allocation2 + $0x18] sm:$0xf] %v254_v37 }
  0xc4   :  { %v460_v38 = vld [vmem:[#allocation2 + $0x38] sm:$0xff] }
  0xc5   :  { %532 = vmatprep.subr.mxu0 %v460_v38 }
  0xc8   :  { %v459_v40 = vld [vmem:[#allocation2] sm:$0xff]  ;;  %v461_v45 = vld [vmem:[#allocation2 + $0x50] sm:$0xff] }
  0xc9   :  { %v462_v41 = vld [vmem:[#allocation2 + $0x18] sm:$0xff]  ;;  %533 = vmatpush1.msra.mxu0 %v459_v40 }
  0xca   :  { %603 = vmatprep.subr.mxu1 %v462_v41  ;;  %1135 = vmatmul.mubr.msk.f32.vlgmr.msra.gmra.mxu0 %vm485_vm11, %v458_v39  ;;  %v483_v46 = vpop.permute.xlu0 %482 }
  0xcb   :  { %604 = vmatpush1.msra.mxu1 %v461_v45  ;;  %978 = vmatprep.mubr.f32.mxu0 %v1269_v0 }
  0xcc   :  { %1138 = vmatmul.mubr.msk.f32.vlgmr.msra.gmra.mxu1 %vm485_vm11, %v458_v39 }
  0xcd   :  { %1049 = vmatprep.mubr.f32.mxu1 %v1269_v0 }
 0x18a   :  { %v568_v47 = vpop.f32.mrf.mxu0 }
 0x18b   :  { %v569_v49 = vadd.f32 %v568_v47, %v483_v46 }
 0x18c   :  { %v639_v50 = vpop.f32.mrf.mxu1  ;;  %v570_v52 = vpop.f32.mrf.mxu0 }
 0x18d   :  { %v640_v51 = vadd.f32 %v639_v50, %v483_v46  ;;  %v644_v56 = vmax.f32 %v569_v49, 0.0  ;;  %v571_v57 = vadd.f32 %v570_v52, %v483_v46 }
 0x18e   :  { %v641_v60 = vpop.f32.mrf.mxu1 }
 0x18f   :  { %v646_v19 = vmax.f32 %v640_v51, 0.0  ;;  %v642_v12 = vadd.f32 %v641_v60, %v483_v46  ;;  %v648_v62 = vmin.f32 %v644_v56, 10.0  ;;  %v645_v63 = vmax.f32 %v571_v57, 0.0 }
 0x191   :  { %v650_v5 = vmin.f32 %v646_v19, 10.0  ;;  %v647_v13 = vmax.f32 %v642_v12, 0.0  ;;  %v652_v20 = vmul.f32 1.5, %v648_v62  ;;  %v649_v6 = vmin.f32 %v645_v63, 10.0  ;;  %v893_v12 = vld [vmem:[%s1845_s4] sm:$0xf] }
 0x193   :  { %v654_v7 = vmul.f32 1.5, %v650_v5  ;;  %v651_v9 = vmin.f32 %v647_v13, 10.0  ;;  %v1147_v0 = vcvt.f32.s32 %v652_v20  ;;  %v653_v10 = vmul.f32 1.5, %v649_v6 }
 0x194   :  { %v1145_v21 = vand.u32 2147483647, %v652_v20  ;;  %v1150_v28 = vand.u32 2147483648, %v652_v20 }
 0x195   :  { %v1163_v14 = vcvt.f32.s32 %v654_v7  ;;  %v655_v15 = vmul.f32 1.5, %v651_v9  ;;  %v1148_v16 = vcvt.s32.f32 %v1147_v0  ;;  %v1155_v18 = vcvt.f32.s32 %v653_v10 }
 0x196   :  { %v1161_v26 = vand.u32 2147483647, %v654_v7  ;;  %v1166_v37 = vand.u32 2147483648, %v654_v7  ;;  %v1153_v38 = vand.u32 2147483647, %v653_v10  ;;  %v1158_v41 = vand.u32 2147483648, %v653_v10 }
 0x197   :  { %v1164_v61 = vcvt.s32.f32 %v1163_v14  ;;  %v1149_v27 = vand.u32 2147483647, %v1148_v16  ;;  %v1156_v29 = vcvt.s32.f32 %v1155_v18  ;;  %v1171_v30 = vcvt.f32.s32 %v655_v15 }
 0x198   :  { %vm1146_vm5 = vcmp.lt.f32.partialorder %v1145_v21, 8388608.0  ;;  %vm1162_vm7 = vcmp.lt.f32.partialorder %v1161_v26, 8388608.0  ;;  %v1169_v47 = vand.u32 2147483647, %v655_v15  ;;  %v1174_v52 = vand.u32 2147483648, %v655_v15 }
 0x199   :  { %v1165_v33 = vand.u32 2147483647, %v1164_v61  ;;  %v1151_v39 = vor.u32 %v1150_v28, %v1149_v27  ;;  %v1157_v40 = vand.u32 2147483647, %v1156_v29  ;;  %v1172_v45 = vcvt.s32.f32 %v1171_v30 }
 0x19a   :  { %vm1154_vm9 = vcmp.lt.f32.partialorder %v1153_v38, 8388608.0  ;;  %vm1170_vm4 = vcmp.lt.f32.partialorder %v1169_v47, 8388608.0 }
 0x19b   :  { %v1167_v46 = vor.u32 %v1166_v37, %v1165_v33  ;;  %v1152_v49 = vsel %vm1146_vm5, %v1151_v39, %v652_v20  ;;  %v1159_v50 = vor.u32 %v1158_v41, %v1157_v40  ;;  %v1173_v51 = vand.u32 2147483647, %v1172_v45 }
 0x19c   :  { %764 = vst [vmem:[#allocation2 + $0x8] sm:$0xf] %v1152_v49  ;;  %820 = vrot.lane.b32.xlu1 %v1152_v49, %s1270_s23 }
 0x19d   :  { %v1168_v56 = vsel %vm1162_vm7, %v1167_v46, %v654_v7  ;;  %v1160_v57 = vsel %vm1154_vm9, %v1159_v50, %v653_v10  ;;  %v1175_v60 = vor.u32 %v1174_v52, %v1173_v51 }
 0x19e   :  { %766 = vst [vmem:[#allocation2 + $0x28] sm:$0xf] %v1168_v56  ;;  %824 = vrot.lane.b32.xlu0 %v1168_v56, %s1270_s23  ;;  %765 = vst [vmem:[#allocation2 + $0x88] sm:$0xf] %v1160_v57 }
 0x19f   :  { %v1176_v19 = vsel %vm1170_vm4, %v1175_v60, %v655_v15 }
 0x1a0   :  { %767 = vst [vmem:[#allocation2 + $0x40] sm:$0xf] %v1176_v19  ;;  %822 = vrot.lane.b32.xlu1 %v1160_v57, %s1270_s23 }
 0x1a2   :  { %852 = vrot.lane.b32.xlu0 %v1152_v49, %s1271_s0 }
 0x1a4   :  { %826 = vrot.lane.b32.xlu1 %v1176_v19, %s1270_s23 }
 0x1a6   :  { %856 = vrot.lane.b32.xlu0 %v1168_v56, %s1271_s0 }
 0x1a8   :  { %854 = vrot.lane.b32.xlu1 %v1160_v57, %s1271_s0 }
 0x1aa   :  { %768 = vrot.lane.b32.xlu0 %v1152_v49, %s1272_s24 }
 0x1ac   :  { %858 = vrot.lane.b32.xlu1 %v1176_v19, %s1271_s0 }
 0x1ae   :  { %772 = vrot.lane.b32.xlu0 %v1168_v56, %s1272_s24 }
 0x1b0   :  { %770 = vrot.lane.b32.xlu1 %v1160_v57, %s1272_s24 }
 0x1b2   :  { %800 = vrot.lane.b32.xlu0 %v1152_v49, %s1273_s25 }
 0x1b4   :  { %774 = vrot.lane.b32.xlu1 %v1176_v19, %s1272_s24 }
 0x1b6   :  { %804 = vrot.lane.b32.xlu0 %v1168_v56, %s1273_s25 }
 0x1b8   :  { %802 = vrot.lane.b32.xlu1 %v1160_v57, %s1273_s25 }
 0x1ba   :  { %732 = vrot.lane.b32.xlu0 %v1152_v49, %s1274_s26 }
 0x1bc   :  { %806 = vrot.lane.b32.xlu1 %v1176_v19, %s1273_s25 }
 0x1be   :  { %736 = vrot.lane.b32.xlu0 %v1168_v56, %s1274_s26 }
 0x1c0   :  { %734 = vrot.lane.b32.xlu1 %v1160_v57, %s1274_s26 }
 0x1c2   :  { %712 = vrot.lane.b32.xlu0 %v1152_v49, %s1275_s27 }
 0x1c4   :  { %738 = vrot.lane.b32.xlu1 %v1176_v19, %s1274_s26 }
 0x1c6   :  { %716 = vrot.lane.b32.xlu0 %v1168_v56, %s1275_s27 }
 0x1c8   :  { %714 = vrot.lane.b32.xlu1 %v1160_v57, %s1275_s27 }
 0x1ca   :  { %680 = vrot.lane.b32.xlu0 %v1152_v49, %s1276_s28 }
 0x1cc   :  { %718 = vrot.lane.b32.xlu1 %v1176_v19, %s1275_s27 }
 0x1ce   :  { %684 = vrot.lane.b32.xlu0 %v1168_v56, %s1276_s28 }
 0x1d0   :  { %682 = vrot.lane.b32.xlu1 %v1160_v57, %s1276_s28 }
 0x1d2   :  { %660 = vrot.lane.b32.xlu0 %v1152_v49, %s1277_s29 }
 0x1d4   :  { %686 = vrot.lane.b32.xlu1 %v1176_v19, %s1276_s28 }
 0x1d6   :  { %664 = vrot.lane.b32.xlu0 %v1168_v56, %s1277_s29 }
 0x1d8   :  { %662 = vrot.lane.b32.xlu1 %v1160_v57, %s1277_s29 }
 0x1da   :  { %896 = vperm.xlu0 %1221, %v893_v12  }
 0x1dc   :  { %666 = vrot.lane.b32.xlu1 %v1176_v19, %s1277_s29 }
 0x20e   :  { %v821_v62 = vpop.permute.xlu1 %820 }
 0x210   :  { %v825_v63 = vpop.permute.xlu0 %824 }
 0x212   :  { %v823_v5 = vpop.permute.xlu1 %822 }
 0x213   :  { %v829_v13 = vsel %vm412_vm1, %v823_v5, %v825_v63  ;;  %v830_v20 = vsel %vm412_vm1, %v821_v62, %v823_v5 }
 0x214   :  { %v853_v6 = vpop.permute.xlu0 %852  ;;  %v833_v7 = vmul.f32 %v1450_v32, %v829_v13  ;;  %v840_v9 = vrot.slane %v830_v20, 4 }
 0x216   :  { %v841_v0 = vrot.slane %v833_v7, 4  ;;  %848 = vst [vmem:[#allocation2 + $0x58] sm:$0xf0] %v840_v9  ;;  %v827_v10 = vpop.permute.xlu1 %826 }
 0x217   :  { %v828_v14 = vsel %vm412_vm1, %v825_v63, %v827_v10  ;;  %v831_v15 = vsel %vm412_vm1, %v827_v10, %v821_v62 }
 0x218   :  { %v857_v16 = vpop.permute.xlu0 %856  ;;  %849 = vst [vmem:[#allocation2 + $0x10] sm:$0xf0] %v841_v0  ;;  %v835_v18 = vmul.f32 %v1423_v22, %v831_v15  ;;  %v842_v21 = vrot.slane %v828_v14, 4 }
 0x21a   :  { %v843_v26 = vrot.slane %v835_v18, 4  ;;  %850 = vst [vmem:[#allocation2 + $0x98] sm:$0xf0] %v842_v21  ;;  %v855_v61 = vpop.permute.xlu1 %854 }
 0x21b   :  { %v861_v32 = vsel %vm445_vm6, %v855_v61, %v857_v16  ;;  %v862_v27 = vsel %vm445_vm6, %v853_v6, %v855_v61 }
 0x21c   :  { %v769_v28 = vpop.permute.xlu0 %768  ;;  %851 = vst [vmem:[#allocation2 + $0x60] sm:$0xf0] %v843_v26  ;;  %v864_v29 = vmul.f32 %v1445_v31, %v862_v27  ;;  %v865_v30 = vmul.f32 %v1478_v44, %v861_v32 }
 0x21e   :  { %868 = vst [vmem:[#allocation2 + $0x20] sm:$0xf] %v864_v29  ;;  %869 = vst [vmem:[#allocation2 + $0x48] sm:$0xf] %v865_v30  ;;  %v859_v33 = vpop.permute.xlu1 %858 }
 0x21f   :  { %v860_v22 = vsel %vm445_vm6, %v857_v16, %v859_v33  ;;  %v863_v37 = vsel %vm445_vm6, %v859_v33, %v853_v6 }
 0x220   :  { %v773_v38 = vpop.permute.xlu0 %772  ;;  %v866_v39 = vmul.f32 %v1475_v43, %v860_v22  ;;  %v867_v40 = vmul.f32 %v1470_v42, %v863_v37 }
 0x222   :  { %870 = vst [vmem:[#allocation2 + $0x70] sm:$0xf] %v866_v39  ;;  %871 = vst [vmem:[#allocation2 + $0x90] sm:$0xf] %v867_v40  ;;  %v771_v41 = vpop.permute.xlu1 %770 }
 0x223   :  { %v777_v44 = vsel %vm358_vm10, %v771_v41, %v773_v38  ;;  %v778_v45 = vsel %vm358_vm10, %v769_v28, %v771_v41 }
 0x224   :  { %v801_v46 = vpop.permute.xlu0 %800  ;;  %v780_v47 = vmul.f32 %v1445_v31, %v778_v45  ;;  %v781_v49 = vmul.f32 %v1501_v59, %v777_v44 }
 0x225   :  { %v890_v50 = vld [vmem:[#allocation2 + $0x48] sm:$0xf]  ;;  %v889_v51 = vld [vmem:[#allocation2 + $0x20] sm:$0xf] }
 0x226   :  { %v788_v52 = vrot.slane %v780_v47, 4  ;;  %v789_v56 = vrot.slane %v781_v49, 4  ;;  %1139 = vmatprep.subr.msk.mxu0 %vm489_vm13, %v890_v50  ;;  %v775_v42 = vpop.permute.xlu1 %774 }
 0x227   :  { %v776_v57 = vsel %vm358_vm10, %v773_v38, %v775_v42  ;;  %v779_v60 = vsel %vm358_vm10, %v775_v42, %v769_v28  ;;  %1140 = vmatpush1.msk.msra.mxu0 %vm489_vm13, %v889_v51 }
 0x228   :  { %v805_v19 = vpop.permute.xlu0 %804  ;;  %796 = vst [vmem:[#allocation2 + $0x8] sm:$0xf0] %v788_v52  ;;  %797 = vst [vmem:[#allocation2 + $0x88] sm:$0xf0] %v789_v56  ;;  %v782_v31 = vmul.f32 %v1475_v43, %v776_v57  ;;  %v783_v12 = vmul.f32 %v1496_v58, %v779_v60 }
 0x229   :  { %v892_v62 = vld [vmem:[#allocation2 + $0x90] sm:$0xf] }
 0x22a   :  { %v891_v63 = vld [vmem:[#allocation2 + $0x70] sm:$0xf]  ;;  %v790_v5 = vrot.slane %v782_v31, 4  ;;  %v791_v13 = vrot.slane %v783_v12, 4  ;;  %1142 = vmatprep.subr.msk.mxu1 %vm489_vm13, %v892_v62  ;;  %v803_v20 = vpop.permute.xlu1 %802 }
 0x22b   :  { %v809_v6 = vsel %vm391_vm14, %v803_v20, %v805_v19  ;;  %v810_v7 = vsel %vm391_vm14, %v801_v46, %v803_v20  ;;  %1143 = vmatpush1.msk.msra.mxu1 %vm489_vm13, %v891_v63 }
 0x22c   :  { %v733_v9 = vpop.permute.xlu0 %732  ;;  %798 = vst [vmem:[#allocation2 + $0x28] sm:$0xf0] %v790_v5  ;;  %799 = vst [vmem:[#allocation2 + $0x40] sm:$0xf0] %v791_v13  ;;  %v812_v43 = vmul.f32 %v1519_v11, %v810_v7  ;;  %v813_v0 = vmul.f32 %v1552_v36, %v809_v6 }
 0x22e   :  { %816 = vst [vmem:[#allocation2 + $0x58] sm:$0xf] %v812_v43  ;;  %817 = vst [vmem:[#allocation2 + $0x10] sm:$0xf] %v813_v0  ;;  %v807_v10 = vpop.permute.xlu1 %806 }
 0x22f   :  { %v808_v14 = vsel %vm391_vm14, %v805_v19, %v807_v10  ;;  %v811_v15 = vsel %vm391_vm14, %v807_v10, %v801_v46  ;;  %v882_v40 = vld [vmem:[#allocation2 + $0x88] sm:$0xff] }
 0x230   :  { %v737_v16 = vpop.permute.xlu0 %736  ;;  %v814_v18 = vmul.f32 %v1549_v25, %v808_v14  ;;  %v815_v21 = vmul.f32 %v1544_v35, %v811_v15  ;;  %v881_v44 = vld [vmem:[#allocation2 + $0x8] sm:$0xff] }
 0x232   :  { %818 = vst [vmem:[#allocation2 + $0x98] sm:$0xf] %v814_v18  ;;  %819 = vst [vmem:[#allocation2 + $0x60] sm:$0xf] %v815_v21  ;;  %v735_v26 = vpop.permute.xlu1 %734 }
 0x233   :  { %v741_v36 = vsel %vm321_vm3, %v735_v26, %v737_v16  ;;  %v742_v61 = vsel %vm321_vm3, %v733_v9, %v735_v26  ;;  %v883_v60 = vld [vmem:[#allocation2 + $0x28] sm:$0xff] }
 0x234   :  { %v713_v32 = vpop.permute.xlu0 %712  ;;  %v745_v27 = vmul.f32 %v1567_v48, %v742_v61  ;;  %v746_v28 = vmul.f32 %v1549_v25, %v741_v36 }
 0x235   :  { %v886_v29 = vld [vmem:[#allocation2 + $0x10] sm:$0xff]  ;;  %v885_v30 = vld [vmem:[#allocation2 + $0x58] sm:$0xff] }
 0x236   :  { %v753_v33 = vrot.slane %v745_v27, 4  ;;  %v754_v22 = vrot.slane %v746_v28, 4  ;;  %938 = vmatprep.subr.mxu0 %v886_v29  ;;  %v739_v35 = vpop.permute.xlu1 %738 }
 0x237   :  { %v740_v37 = vsel %vm321_vm3, %v737_v16, %v739_v35  ;;  %v743_v38 = vsel %vm321_vm3, %v739_v35, %v733_v9  ;;  %939 = vmatpush1.msra.mxu0 %v885_v30 }
 0x238   :  { %v717_v39 = vpop.permute.xlu0 %716  ;;  %761 = vst [vmem:[#allocation2 + $0x68] sm:$0xf0] %v753_v33  ;;  %762 = vst [vmem:[#allocation2 + $0x78] sm:$0xf0] %v754_v22  ;;  %v744_v41 = vmul.f32 %v1519_v11, %v743_v38  ;;  %v747_v25 = vmul.f32 %v1575_v53, %v740_v37  ;;  %940 = vmatprep.subr.mxu0 %v882_v40  ;;  %v884_v11 = vld [vmem:[#allocation2 + $0x40] sm:$0xff] }
 0x239   :  { %941 = vmatpush1.msra.mxu0 %v881_v44  ;;  %v888_v45 = vld [vmem:[#allocation2 + $0x60] sm:$0xff]  ;;  %v887_v46 = vld [vmem:[#allocation2 + $0x98] sm:$0xff] }
 0x23a   :  { %v752_v47 = vrot.slane %v744_v41, 4  ;;  %v755_v49 = vrot.slane %v747_v25, 4  ;;  %1009 = vmatprep.subr.mxu1 %v888_v45  ;;  %v715_v50 = vpop.permute.xlu1 %714 }
 0x23b   :  { %v721_v51 = vsel %vm300_vm12, %v715_v50, %v717_v39  ;;  %v722_v52 = vsel %vm300_vm12, %v713_v32, %v715_v50  ;;  %1010 = vmatpush1.msra.mxu1 %v887_v46 }
 0x23c   :  { %v681_v56 = vpop.permute.xlu0 %680  ;;  %760 = vst [vmem:[#allocation2 + $0x30] sm:$0xf0] %v752_v47  ;;  %763 = vst [vmem:[#allocation2 + $0x80] sm:$0xf0] %v755_v49  ;;  %v725_v42 = vmul.f32 %v1501_v59, %v722_v52  ;;  %v726_v57 = vmul.f32 %v1626_v34, %v721_v51  ;;  %1011 = vmatprep.subr.mxu1 %v884_v11 }
 0x23d   :  { %1012 = vmatpush1.msra.mxu1 %v883_v60 }
 0x23e   :  { %729 = vst [vmem:[#allocation2 + $0x68] sm:$0xf] %v725_v42  ;;  %730 = vst [vmem:[#allocation2 + $0x78] sm:$0xf] %v726_v57  ;;  %v719_v19 = vpop.permute.xlu1 %718 }
 0x23f   :  { %v720_v31 = vsel %vm300_vm12, %v717_v39, %v719_v19  ;;  %v723_v12 = vsel %vm300_vm12, %v719_v19, %v713_v32 }
 0x240   :  { %v685_v62 = vpop.permute.xlu0 %684  ;;  %v724_v63 = vmul.f32 %v1621_v17, %v723_v12  ;;  %v727_v5 = vmul.f32 %v1496_v58, %v720_v31 }
 0x242   :  { %728 = vst [vmem:[#allocation2 + $0x30] sm:$0xf] %v724_v63  ;;  %731 = vst [vmem:[#allocation2 + $0x80] sm:$0xf] %v727_v5  ;;  %v683_v59 = vpop.permute.xlu1 %682 }
 0x243   :  { %v689_v34 = vsel %vm267_vm2, %v683_v59, %v685_v62  ;;  %v690_v13 = vsel %vm267_vm2, %v681_v56, %v683_v59 }
 0x244   :  { %v694_v20 = vmul.f32 %v1648_v55, %v689_v34  ;;  %v701_v6 = vrot.slane %v690_v13, 4  ;;  %v661_v7 = vpop.permute.xlu0 %660 }
 0x245   :  { %v878_v9 = vld [vmem:[#allocation2 + $0x68] sm:$0xff]  ;;  %v879_v26 = vld [vmem:[#allocation2 + $0x78] sm:$0xff] }
 0x246   :  { %v702_v43 = vrot.slane %v694_v20, 4  ;;  %709 = vst [vmem:[#allocation2 + $0x38] sm:$0xf0] %v701_v6  ;;  %v687_v0 = vpop.permute.xlu1 %686  ;;  %942 = vmatprep.subr.mxu0 %v878_v9 }
 0x247   :  { %v688_v58 = vsel %vm267_vm2, %v685_v62, %v687_v0  ;;  %v691_v17 = vsel %vm267_vm2, %v687_v0, %v681_v56 }
 0x248   :  { %710 = vst [vmem:[#allocation2 + $0x50] sm:$0xf0] %v702_v43  ;;  %v692_v10 = vmul.f32 %v1643_v54, %v691_v17  ;;  %v703_v14 = vrot.slane %v688_v58, 4  ;;  %v665_v18 = vpop.permute.xlu0 %664 }
 0x249   :  { %v880_v15 = vld [vmem:[#allocation2 + $0x80] sm:$0xff]  ;;  %v877_v16 = vld [vmem:[#allocation2 + $0x30] sm:$0xff] }
 0x24a   :  { %v700_v55 = vrot.slane %v692_v10, 4  ;;  %711 = vst [vmem:[#allocation2 + $0x18] sm:$0xf0] %v703_v14  ;;  %1013 = vmatprep.subr.mxu1 %v880_v15  ;;  %v663_v21 = vpop.permute.xlu1 %662  ;;  %943 = vmatpush1.msra.mxu0 %v877_v16 }
 0x24b   :  { %v669_v36 = vsel %vm246_vm8, %v663_v21, %v665_v18  ;;  %v670_v61 = vsel %vm246_vm8, %v661_v7, %v663_v21  ;;  %1014 = vmatpush1.msra.mxu1 %v879_v26 }
 0x24c   :  { %708 = vst [vmem:[#allocation2] sm:$0xf0] %v700_v55  ;;  %v673_v54 = vmul.f32 %v1567_v48, %v670_v61  ;;  %v674_v32 = vmul.f32 %v1680_v24, %v669_v36  ;;  %v872_v48 = vld [vmem:[%s1844_s3] sm:$0xf]  ;;  %s1279_s3 = smov [#allocation6]  }
 0x24d   :  { %s1096_s10 = sshll.u32 %s1279_s3, 4  ;;  %s1097_s10 = int_to_ptr.vmem [resolvable:$true] %s1096_s10 }
 0x24e   :  { %677 = vst [vmem:[#allocation2 + $0x38] sm:$0xf] %v673_v54  ;;  %678 = vst [vmem:[#allocation2 + $0x50] sm:$0xf] %v674_v32  ;;  %v667_v27 = vpop.permute.xlu1 %666  ;;  %s1244_s11 = scalar_lea.vmem %s1097_s10, 256  ;;  %p1249_p6 = scmp.lt.s32.totalorder %s1097_s10, %s1097_s10 }
 0x24f   :  { %v668_v28 = vsel %vm246_vm8, %v665_v18, %v667_v27  ;;  %v671_v29 = vsel %vm246_vm8, %v667_v27, %v661_v7  ;;  %p1245_p5 = scmp.ne.s32.totalorder %s1097_s10, %s1244_s11  ;;  %p1250_p7 = scmp.lt.s32.totalorder %s1244_s11, %s1244_s11 }
 0x250   :  { %v672_v30 = vmul.f32 %v1677_v23, %v671_v29  ;;  %v675_v33 = vmul.f32 %v1575_v53, %v668_v28 }
 0x251   :  { %p1251_p8 = por %p1250_p7, %p1249_p6 }
 0x252   :  { %676 = vst [vmem:[#allocation2] sm:$0xf] %v672_v30  ;;  %679 = vst [vmem:[#allocation2 + $0x18] sm:$0xf] %v675_v33 }
 0x253   :  { %p1252_p9 = pnand %p1251_p8, %p1245_p5 }
 0x255   :  { %v874_v22 = vld [vmem:[#allocation2 + $0x38] sm:$0xff]  ;;  %v875_v37 = vld [vmem:[#allocation2 + $0x50] sm:$0xff]  ;;  %v897_v8 = vpop.permute.xlu0 %896 }
 0x256   :  { %944 = vmatprep.subr.mxu0 %v874_v22 }
 0x259   :  { %v873_v24 = vld [vmem:[#allocation2] sm:$0xff]  ;;  %v876_v35 = vld [vmem:[#allocation2 + $0x18] sm:$0xff] }
 0x25a   :  { %945 = vmatpush1.msra.mxu0 %v873_v24  ;;  %1015 = vmatprep.subr.mxu1 %v876_v35 }
 0x25b   :  { %1141 = vmatmul.mubr.msk.f32.vlgmr.msra.gmra.mxu0 %vm485_vm11, %v872_v48  ;;  %1016 = vmatpush1.msra.mxu1 %v875_v37 }
 0x25c   :  { %1144 = vmatmul.mubr.msk.f32.vlgmr.msra.gmra.mxu1 %vm485_vm11, %v872_v48 }
 0x31b   :  { %v980_v53 = vpop.f32.mrf.mxu0 }
 0x31c   :  { %v981_v23 = vadd.f32 %v980_v53, %v897_v8  ;;  %v1051_v38 = vpop.f32.mrf.mxu1 }
 0x31d   :  { %v1052_v39 = vadd.f32 %v1051_v38, %v897_v8  ;;  %v982_v40 = vpop.f32.mrf.mxu0 }
 0x31e   :  { %v1056_v41 = vadd.f32 %v981_v23, %v1317_v2  ;;  %v983_v25 = vadd.f32 %v982_v40, %v897_v8  ;;  %v1053_v44 = vpop.f32.mrf.mxu1 }
 0x31f   :  { %v1058_v45 = vadd.f32 %v1052_v39, %v1315_v1  ;;  %v1054_v46 = vadd.f32 %v1053_v44, %v897_v8 }
 0x320   :  { %v1060_v47 = vmax.f32 %v1056_v41, 0.0  ;;  %v1057_v49 = vadd.f32 %v983_v25, %v1331_v4 }
 0x321   :  { %v1062_v50 = vmax.f32 %v1058_v45, 0.0  ;;  %v1059_v51 = vadd.f32 %v1054_v46, %v1327_v3 }
 0x322   :  { %v1064_v52 = vmin.f32 %v1060_v47, 10.0  ;;  %v1061_v56 = vmax.f32 %v1057_v49, 0.0 }
 0x323   :  { %v1066_v11 = vmin.f32 %v1062_v50, 10.0  ;;  %v1063_v42 = vmax.f32 %v1059_v51, 0.0 }
 0x324   :  { %v1068_v57 = vmul.f32 1.5, %v1064_v52  ;;  %v1065_v60 = vmin.f32 %v1061_v56, 10.0 }
 0x325   :  { %v1070_v19 = vmul.f32 1.5, %v1066_v11  ;;  %v1067_v31 = vmin.f32 %v1063_v42, 10.0 }
 0x326   :  { %v1179_v2 = vcvt.f32.s32 %v1068_v57  ;;  %v1069_v12 = vmul.f32 1.5, %v1065_v60  ;;  %v1177_v4 = vand.u32 2147483647, %v1068_v57  ;;  %v1182_v20 = vand.u32 2147483648, %v1068_v57 }
 0x327   :  { %v1195_v62 = vcvt.f32.s32 %v1070_v19  ;;  %v1071_v63 = vmul.f32 1.5, %v1067_v31  ;;  %v1193_v6 = vand.u32 2147483647, %v1070_v19  ;;  %v1198_v9 = vand.u32 2147483648, %v1070_v19 }
 0x328   :  { %v1180_v1 = vcvt.s32.f32 %v1179_v2  ;;  %v1187_v5 = vcvt.f32.s32 %v1069_v12  ;;  %v1185_v0 = vand.u32 2147483647, %v1069_v12  ;;  %v1190_v17 = vand.u32 2147483648, %v1069_v12 }
 0x329   :  { %v1196_v59 = vcvt.s32.f32 %v1195_v62  ;;  %v1203_v34 = vcvt.f32.s32 %v1071_v63  ;;  %v1201_v14 = vand.u32 2147483647, %v1071_v63  ;;  %v1206_v16 = vand.u32 2147483648, %v1071_v63 }
 0x32a   :  { %v1181_v13 = vand.u32 2147483647, %v1180_v1  ;;  %v1188_v3 = vcvt.s32.f32 %v1187_v5  ;;  %vm1178_vm1 = vcmp.lt.f32.partialorder %v1177_v4, 8388608.0  ;;  %vm1194_vm6 = vcmp.lt.f32.partialorder %v1193_v6, 8388608.0 }
 0x32b   :  { %v1197_v7 = vand.u32 2147483647, %v1196_v59  ;;  %v1204_v43 = vcvt.s32.f32 %v1203_v34  ;;  %vm1186_vm10 = vcmp.lt.f32.partialorder %v1185_v0, 8388608.0  ;;  %vm1202_vm13 = vcmp.lt.f32.partialorder %v1201_v14, 8388608.0 }
 0x32c   :  { %v1189_v58 = vand.u32 2147483647, %v1188_v3  ;;  %v1183_v10 = vor.u32 %v1182_v20, %v1181_v13 }
 0x32d   :  { %v1205_v15 = vand.u32 2147483647, %v1204_v43  ;;  %v1199_v55 = vor.u32 %v1198_v9, %v1197_v7 }
 0x32e   :  { %v1184_v18 = vsel %vm1178_vm1, %v1183_v10, %v1068_v57  ;;  %v1191_v21 = vor.u32 %v1190_v17, %v1189_v58 }
 0x32f   :  { %v1200_v26 = vsel %vm1194_vm6, %v1199_v55, %v1070_v19  ;;  %v1207_v36 = vor.u32 %v1206_v16, %v1205_v15  ;;  %v1076_v32 = vmul.f32 0.6666667, %v1184_v18 }
 0x330   :  { %v1192_v61 = vsel %vm1186_vm10, %v1191_v21, %v1069_v12  ;;  %v1078_v28 = vmul.f32 0.6666667, %v1200_v26 }
 0x331   :  { %v1208_v54 = vsel %vm1202_vm13, %v1207_v36, %v1071_v63  ;;  %v1077_v27 = vmul.f32 0.6666667, %v1192_v61 }
 0x332   :  { %v1079_v29 = vmul.f32 0.6666667, %v1208_v54 }
 0x333   :  { %v1084_v30 = vcombine.low %v1076_v32, %v1077_v27 }
 0x334   :  { %v1085_v33 = vcombine.low %v1078_v28, %v1079_v29 }
 0x335   :  { %1088 = vst [vmem:[#allocation6] sm:$0xff] %v1084_v30 }
 0x336   :  { %1089 = vst [vmem:[#allocation6 + $0x8] sm:$0xff] %v1085_v33 }
 0x337   :  { %1255 = shalt.err (!%p1252_p9)
}
 0x338   :  { %1099 = dma.vmem_to_hbm [thread:$0]  %s1097_s10, 256, %s1846_s5, [#allocation5]  }
 0x339   :  { %1266 = dma.done.wait [#allocation5], 256  }
 0x33a   :  { %1267 = vsyncadd [#allocation5], 4294967040 }
 0x33b   :  { %1103 = vsyncpa [#allocation4], 1 }
 0x33c   :  { %1104 = vsyncpa [#allocation5], 1 }

</bundles_post_ra>
